<compile_context>
chip_gen: v6e
topology: v6e:2x2x1
jax: 0.10.0
libtpu: 0.0.40
codegen_flags: <defaults>
</compile_context>

<pallas_src>
import functools

import numpy as np
import jax
import jax.numpy as jnp
from jax.experimental import pallas as pl
from jax.experimental.pallas import tpu as pltpu

BN_EPS = 1e-5


def _vmem():
    return pl.BlockSpec(memory_space=pltpu.MemorySpace.VMEM)


def _round_up(x, m):
    return ((x + m - 1) // m) * m


def _pick_tile(n_padded, prefs, min_tiles=1):
    """Largest preferred tile dividing n_padded, preferring >= min_tiles tiles."""
    for p in prefs:
        if p <= n_padded and n_padded % p == 0 and n_padded // p >= min_tiles:
            return p
    for p in prefs:
        if p <= n_padded and n_padded % p == 0:
            return p
    return n_padded


def _pad2(a, rows, cols, dtype=jnp.float32):
    out = jnp.zeros((rows, cols), dtype)
    return out.at[: a.shape[0], : a.shape[1]].set(a.astype(dtype))


# ---------------------------------------------------------------------------
# Kernel 1: block-diagonal GIN aggregation fused with the first MLP linear.
#   acc = Adj_row_tile @ h   (only over this row tile's own graph column blocks)
#         + (1 + eps) * h_row_tile            (f32, exact)
#   y1  = acc @ W1 + b1, padded rows masked to 0 (written once, at the last k step)
# ---------------------------------------------------------------------------
def _agg_linear_kernel(cb_ref, nk_ref, adj_ref, hk_ref, hrow_ref, eps_ref,
                       w_ref, b_ref, out_ref, acc_ref, *, n_real, tm):
    i = pl.program_id(0)
    k = pl.program_id(1)

    @pl.when(k == 0)
    def _init():
        acc_ref[...] = (1.0 + eps_ref[0]) * hrow_ref[...]

    # Native bf16 x bf16 MXU matmul with f32 accumulation (no f32 upcast temp).
    @pl.when(k < nk_ref[i])
    def _accum():
        acc_ref[...] += jnp.dot(adj_ref[...], hk_ref[...],
                                preferred_element_type=jnp.float32)

    @pl.when(k == pl.num_programs(1) - 1)
    def _finalize():
        y = jnp.dot(acc_ref[...], w_ref[...],
                    preferred_element_type=jnp.float32) + b_ref[...]
        row = i * tm + jax.lax.broadcasted_iota(jnp.int32, y.shape, 0)
        out_ref[...] = jnp.where(row < n_real, y, 0.0)   # keep padded rows exactly 0


def gin_aggregate_linear(adj_bf16, h_bf16, h_f32, eps_arr, w_pad, b_pad,
                         col_blk, nk, max_nk, *, n_real, tm, tk,
                         vmem_limit_bytes=32 * 1024 * 1024):
    np_, d_in = h_f32.shape
    d_out = w_pad.shape[1]
    grid = (np_ // tm, max_nk)

    kern = functools.partial(_agg_linear_kernel, n_real=n_real, tm=tm)

    # col-block schedule lives in SMEM (scalar prefetch) and drives the index maps.
    def adj_map(i, k, cb_r, nk_r):
        return (i, cb_r[i * max_nk + k])

    def hk_map(i, k, cb_r, nk_r):
        return (cb_r[i * max_nk + k], 0)

    return pl.pallas_call(
        kern,
        out_shape=jax.ShapeDtypeStruct((np_, d_out), jnp.float32),
        grid_spec=pltpu.PrefetchScalarGridSpec(
            num_scalar_prefetch=2,
            grid=grid,
            in_specs=[
                pl.BlockSpec((tm, tk), adj_map),                         # Adj tile (bf16)
                pl.BlockSpec((tk, d_in), hk_map),                        # h bf16, reduction blocks
                pl.BlockSpec((tm, d_in), lambda i, k, cb_r, nk_r: (i, 0)),  # h f32 row block (eps term)
                pl.BlockSpec(memory_space=pltpu.MemorySpace.SMEM),       # eps scalar
                pl.BlockSpec((d_in, d_out), lambda i, k, cb_r, nk_r: (0, 0)),  # W1 resident
                pl.BlockSpec((1, d_out), lambda i, k, cb_r, nk_r: (0, 0)),     # b1 resident
            ],
            out_specs=pl.BlockSpec((tm, d_out), lambda i, k, cb_r, nk_r: (i, 0)),
            scratch_shapes=[pltpu.VMEM((tm, d_in), jnp.float32)],
        ),
        compiler_params=pltpu.CompilerParams(
            dimension_semantics=("parallel", "arbitrary"),
            vmem_limit_bytes=vmem_limit_bytes),
    )(col_blk, nk, adj_bf16, h_bf16, h_f32, eps_arr, w_pad, b_pad)


# ---------------------------------------------------------------------------
# Kernel 2a: tiled BatchNorm statistics (sum / sum-of-squares over rows).
# Padded rows are exactly zero, so dividing by the real n gives exact stats.
# ---------------------------------------------------------------------------
def _bn_stats_kernel(x_ref, stats_ref):
    @pl.when(pl.program_id(0) == 0)
    def _():
        stats_ref[...] = jnp.zeros_like(stats_ref)
    x = x_ref[...]
    stats_ref[...] += jnp.concatenate(
        [jnp.sum(x, axis=0, keepdims=True),
         jnp.sum(x * x, axis=0, keepdims=True)], axis=0)


def bn_stats(x, *, tr):
    np_, d = x.shape
    return pl.pallas_call(
        _bn_stats_kernel,
        out_shape=jax.ShapeDtypeStruct((2, d), jnp.float32),
        grid=(np_ // tr,),
        in_specs=[pl.BlockSpec((tr, d), lambda i: (i, 0))],
        out_specs=pl.BlockSpec((2, d), lambda i: (0, 0)),
        compiler_params=pltpu.CompilerParams(dimension_semantics=("arbitrary",)),
    )(x)


def _scale_shift(stats_ref, g_ref, be_ref, inv_n):
    mean = stats_ref[0:1, :] * inv_n
    var = jnp.maximum(stats_ref[1:2, :] * inv_n - mean * mean, 0.0)
    scale = g_ref[...] * jax.lax.rsqrt(var + BN_EPS)
    shift = be_ref[...] - mean * scale
    return scale, shift


# ---------------------------------------------------------------------------
# Kernel 2b: tiled  BN -> ReLU -> Linear,  fused with the NEXT BN's statistics
# (second, grid-resident output), padded rows masked back to zero.
# ---------------------------------------------------------------------------
def _bn_relu_linear_stats_kernel(x_ref, stats_ref, g_ref, be_ref, w_ref, b_ref,
                                 y_ref, stats_out_ref, *, n_real, tr):
    i = pl.program_id(0)
    scale, shift = _scale_shift(stats_ref, g_ref, be_ref, 1.0 / n_real)
    t = jnp.maximum(x_ref[...] * scale + shift, 0.0)
    y = jnp.dot(t, w_ref[...], preferred_element_type=jnp.float32) + b_ref[...]
    row = i * tr + jax.lax.broadcasted_iota(jnp.int32, y.shape, 0)
    y = jnp.where(row < n_real, y, 0.0)
    y_ref[...] = y

    @pl.when(i == 0)
    def _():
        stats_out_ref[...] = jnp.zeros_like(stats_out_ref)

    stats_out_ref[...] += jnp.concatenate(
        [jnp.sum(y, axis=0, keepdims=True),
         jnp.sum(y * y, axis=0, keepdims=True)], axis=0)


def bn_relu_linear_stats(x, stats, gamma, beta, w, b, *, n_real, tr):
    np_, d_in = x.shape
    d_out = w.shape[1]
    kern = functools.partial(_bn_relu_linear_stats_kernel, n_real=n_real, tr=tr)
    return pl.pallas_call(
        kern,
        out_shape=(jax.ShapeDtypeStruct((np_, d_out), jnp.float32),
                   jax.ShapeDtypeStruct((2, d_out), jnp.float32)),
        grid=(np_ // tr,),
        in_specs=[
            pl.BlockSpec((tr, d_in), lambda i: (i, 0)),
            pl.BlockSpec((2, d_in), lambda i: (0, 0)),
            pl.BlockSpec((1, d_in), lambda i: (0, 0)),
            pl.BlockSpec((1, d_in), lambda i: (0, 0)),
            pl.BlockSpec((d_in, d_out), lambda i: (0, 0)),
            pl.BlockSpec((1, d_out), lambda i: (0, 0)),
        ],
        out_specs=(pl.BlockSpec((tr, d_out), lambda i: (i, 0)),
                   pl.BlockSpec((2, d_out), lambda i: (0, 0))),
        compiler_params=pltpu.CompilerParams(dimension_semantics=("arbitrary",)),
    )(x, stats, gamma, beta, w, b)


# ---------------------------------------------------------------------------
# Kernel 2c: tiled final  BN -> ReLU  apply.  Also emits the bf16 copy of h
# needed by the next layer's aggregation (avoids a separate cast round trip).
# ---------------------------------------------------------------------------
def _bn_relu_apply_kernel(x_ref, stats_ref, g_ref, be_ref, h_ref, hbf_ref,
                          *, n_real, tr):
    i = pl.program_id(0)
    scale, shift = _scale_shift(stats_ref, g_ref, be_ref, 1.0 / n_real)
    t = jnp.maximum(x_ref[...] * scale + shift, 0.0)
    row = i * tr + jax.lax.broadcasted_iota(jnp.int32, t.shape, 0)
    t = jnp.where(row < n_real, t, 0.0)
    h_ref[...] = t
    hbf_ref[...] = t.astype(jnp.bfloat16)


def bn_relu_apply(x, stats, gamma, beta, *, n_real, tr):
    np_, d = x.shape
    kern = functools.partial(_bn_relu_apply_kernel, n_real=n_real, tr=tr)
    return pl.pallas_call(
        kern,
        out_shape=(jax.ShapeDtypeStruct((np_, d), jnp.float32),
                   jax.ShapeDtypeStruct((np_, d), jnp.bfloat16)),
        grid=(np_ // tr,),
        in_specs=[
            pl.BlockSpec((tr, d), lambda i: (i, 0)),
            pl.BlockSpec((2, d), lambda i: (0, 0)),
            pl.BlockSpec((1, d), lambda i: (0, 0)),
            pl.BlockSpec((1, d), lambda i: (0, 0)),
        ],
        out_specs=(pl.BlockSpec((tr, d), lambda i: (i, 0)),
                   pl.BlockSpec((tr, d), lambda i: (i, 0))),
        compiler_params=pltpu.CompilerParams(dimension_semantics=("parallel",)),
    )(x, stats, gamma, beta)


# ---------------------------------------------------------------------------
# Kernel 3: fused prediction head over all hidden representations.
#   score = sum_layer (graph_pool @ h_layer) @ W_layer + b_layer
# All operands are lane/sublane padded (B->8, out_dim->128) => unmasked stores.
# ---------------------------------------------------------------------------
def _make_pool_predict_kernel(num_reps):
    def kernel(gp_ref, *refs):
        out_ref = refs[-1]
        acc = None
        for l in range(num_reps):
            h_ref, w_ref, b_ref = refs[3 * l: 3 * l + 3]
            pooled = jnp.dot(gp_ref[...], h_ref[...], preferred_element_type=jnp.float32)
            contrib = jnp.dot(pooled, w_ref[...], preferred_element_type=jnp.float32) + b_ref[...]
            acc = contrib if acc is None else acc + contrib
        out_ref[...] = acc
    return kernel


def pool_predict_fused(graph_pool_pad, hidden_reps, pred_params_pad, out_pad):
    # TODO(synk): tile the node dimension for extremely large N (hidden reps are
    # held resident in VMEM here; num_layers * N_pad * 128 * 4B must fit).
    bsz_pad = graph_pool_pad.shape[0]
    args = [graph_pool_pad]
    for h, (w, b) in zip(hidden_reps, pred_params_pad):
        args += [h, w, b]
    return pl.pallas_call(
        _make_pool_predict_kernel(len(hidden_reps)),
        out_shape=jax.ShapeDtypeStruct((bsz_pad, out_pad), jnp.float32),
        in_specs=[_vmem()] * len(args),
        out_specs=_vmem(),
    )(*args)


# ---------------------------------------------------------------------------
# Parameter init (deterministic, mimicking nn.Linear defaults) and forward.
# ---------------------------------------------------------------------------
def init_linear(key, in_dim, out_dim):
    k1, k2 = jax.random.split(key)
    bound = 1.0 / (in_dim ** 0.5)
    w = jax.random.uniform(k1, (in_dim, out_dim), jnp.float32, -bound, bound)
    b = jax.random.uniform(k2, (1, out_dim), jnp.float32, -bound, bound)
    return w, b


def init_params(key, num_layers, num_mlp_layers, input_dim, hidden_dim, output_dim):
    params = {
        "eps": jnp.zeros((num_layers - 1,), jnp.float32),  # nn.Parameter(torch.zeros(...))
        "mlps": [],
        "bn": [],
        "pred": [],
    }
    for layer in range(num_layers - 1):
        in_d = input_dim if layer == 0 else hidden_dim
        dims = [in_d] + [hidden_dim] * num_mlp_layers
        mlp = []
        for l in range(num_mlp_layers):
            key, sub = jax.random.split(key)
            w, b = init_linear(sub, dims[l], dims[l + 1])
            g = jnp.ones((1, dims[l + 1]), jnp.float32)    # MLP-internal BN gamma
            be = jnp.zeros((1, dims[l + 1]), jnp.float32)  # MLP-internal BN beta
            mlp.append((w, b, g, be))
        params["mlps"].append(mlp)
        params["bn"].append(
            (jnp.ones((1, hidden_dim), jnp.float32), jnp.zeros((1, hidden_dim), jnp.float32))
        )
    for layer in range(num_layers):
        in_d = input_dim if layer == 0 else hidden_dim
        key, sub = jax.random.split(key)
        params["pred"].append(init_linear(sub, in_d, output_dim))
    return params


def graphcnn_forward(params, x, adj, graph_pool, graph_node_counts,
                     num_layers, num_mlp_layers,
                     *, tile_m=512, tile_k=1024, tile_rows=512):
    # Per-generation tuning: v6e -> defaults; v7x -> tile_k=2048 (3.2 TB/s HBM);
    # v5e -> defaults are fine (explicit vmem_limit_bytes raises its 16 MiB default).
    n, input_dim = x.shape
    hidden_dim = params["mlps"][0][0][0].shape[1]
    output_dim = params["pred"][0][0].shape[1]
    b_graphs = graph_pool.shape[0]

    np_ = _round_up(max(n, 128), 128)
    in_pad = _round_up(input_dim, 128)
    hid_pad = _round_up(hidden_dim, 128)
    out_pad = _round_up(output_dim, 128)

    tm = _pick_tile(np_, (tile_m, 512, 256, 128), min_tiles=2)   # keep >=2 row tiles (megacore)
    tk = _pick_tile(np_, (tile_k, 1024, 512, 256, 128), min_tiles=1)
    tr = _pick_tile(np_, (tile_rows, 512, 256, 128), min_tiles=2)

    # ---- host-side block-diagonal schedule for K1 (static, from graph sizes) ----
    starts = np.cumsum([0] + list(graph_node_counts)).astype(np.int64)
    assert int(starts[-1]) == n
    num_row_tiles = np_ // tm
    first_blk = np.zeros(num_row_tiles, np.int32)
    nk_arr = np.zeros(num_row_tiles, np.int32)
    for i in range(num_row_tiles):
        lo, hi = i * tm, min((i + 1) * tm, n)
        if lo >= n:
            continue
        g_lo = int(np.searchsorted(starts, lo, side="right") - 1)
        g_hi = int(np.searchsorted(starts, hi - 1, side="right") - 1)
        col_lo, col_hi = int(starts[g_lo]), int(starts[g_hi + 1])
        fb, lb = col_lo // tk, (col_hi - 1) // tk
        first_blk[i], nk_arr[i] = fb, lb - fb + 1
    max_nk = max(int(nk_arr.max()), 1)
    col_blk_tbl = np.zeros((num_row_tiles, max_nk), np.int32)
    for i in range(num_row_tiles):
        for k in range(max_nk):
            kk = min(k, max(int(nk_arr[i]) - 1, 0))   # clamp -> no extra DMA, dot gated off
            col_blk_tbl[i, k] = first_blk[i] + kk
    col_blk = jnp.asarray(col_blk_tbl.reshape(-1))
    nk = jnp.asarray(nk_arr)

    # ---- padded, lane-dense layouts carried end to end ----
    adj_pad = _pad2(adj, np_, np_, jnp.bfloat16)          # exact for 0/1 entries
    gp_pad = _pad2(graph_pool, _round_up(b_graphs, 8), np_, jnp.float32)

    h_f32 = _pad2(x, np_, in_pad, jnp.float32)            # padded rows/cols exactly zero
    h_bf16 = h_f32.astype(jnp.bfloat16)

    hidden_reps = [h_f32]
    for layer in range(num_layers - 1):
        mlp = params["mlps"][layer]
        d_in_pad = in_pad if layer == 0 else hid_pad
        w1p = _pad2(mlp[0][0], d_in_pad, hid_pad)
        b1p = _pad2(mlp[0][1], 1, hid_pad)
        eps_arr = jnp.reshape(params["eps"][layer], (1,)).astype(jnp.float32)

        # K1: pooled = Adj @ h + (1+eps) h ; y1 = pooled @ W1 + b1   (block-diag, bf16 MXU)
        y = gin_aggregate_linear(adj_pad, h_bf16, h_f32, eps_arr, w1p, b1p,
                                 col_blk, nk, max_nk, n_real=n, tm=tm, tk=tk)

        # K2: tiled two-pass BN -> ReLU -> Linear -> ... -> outer BN -> ReLU
        stats = bn_stats(y, tr=tr)
        for l in range(1, num_mlp_layers):
            g_prev = _pad2(mlp[l - 1][2], 1, hid_pad)
            be_prev = _pad2(mlp[l - 1][3], 1, hid_pad)
            w_l = _pad2(mlp[l][0], hid_pad, hid_pad)
            b_l = _pad2(mlp[l][1], 1, hid_pad)
            y, stats = bn_relu_linear_stats(y, stats, g_prev, be_prev, w_l, b_l,
                                            n_real=n, tr=tr)
        g_out = _pad2(params["bn"][layer][0], 1, hid_pad)
        be_out = _pad2(params["bn"][layer][1], 1, hid_pad)
        h_f32, h_bf16 = bn_relu_apply(y, stats, g_out, be_out, n_real=n, tr=tr)
        hidden_reps.append(h_f32)

    pred_pad = []
    for layer, (w, b) in enumerate(params["pred"]):
        d_in_pad = in_pad if layer == 0 else hid_pad
        pred_pad.append((_pad2(w, d_in_pad, out_pad), _pad2(b, 1, out_pad)))

    # K3: final_dropout = 0.0 => F.dropout is identity
    score = pool_predict_fused(gp_pad, hidden_reps, pred_pad, out_pad)
    return score[:b_graphs, :output_dim]


# Pure-JAX reference for correctness checking (straight port of the PyTorch math).
def ref_forward(params, x, adj, graph_pool, num_layers, num_mlp_layers):
    def bn_relu(y, g, be):
        mean = jnp.mean(y, axis=0, keepdims=True)
        var = jnp.mean((y - mean) ** 2, axis=0, keepdims=True)
        return jnp.maximum((y - mean) / jnp.sqrt(var + BN_EPS) * g + be, 0.0)

    hidden = [x]
    h = x
    for layer in range(num_layers - 1):
        pooled = adj @ h + (1.0 + params["eps"][layer]) * h
        t = pooled
        mlp = params["mlps"][layer]
        for l in range(num_mlp_layers - 1):
            w, b, g, be = mlp[l]
            t = bn_relu(t @ w + b, g, be)
        w, b, _, _ = mlp[-1]
        g, be = params["bn"][layer]
        h = bn_relu(t @ w + b, g, be)
        hidden.append(h)
    score = 0.0
    for layer, h in enumerate(hidden):
        w, b = params["pred"][layer]
        score = score + (graph_pool @ h) @ w + b
    return score


if __name__ == "__main__":
    # Small synthetic batch: 4 graphs x 40 nodes each => N=160, padded to 256.
    B, N_PER = 4, 40
    N = B * N_PER
    INPUT_DIM, HIDDEN_DIM, OUTPUT_DIM = 16, 32, 4
    NUM_LAYERS, NUM_MLP_LAYERS = 3, 2

    key = jax.random.PRNGKey(0)
    key, kx, ka = jax.random.split(key, 3)

    # node features concatenated over the batch: X_concat
    x = jax.random.normal(kx, (N, INPUT_DIM), jnp.float32)

    # block-diagonal symmetric adjacency, no self-loops (learn_eps=True branch)
    adj = jnp.zeros((N, N), jnp.float32)
    for i in range(B):
        ka, sub = jax.random.split(ka)
        a = (jax.random.uniform(sub, (N_PER, N_PER)) > 0.7).astype(jnp.float32)
        a = jnp.triu(a, 1)
        a = a + a.T
        adj = adj.at[i * N_PER:(i + 1) * N_PER, i * N_PER:(i + 1) * N_PER].set(a)

    # sum graph pooling matrix [B, N]
    graph_pool = jnp.zeros((B, N), jnp.float32)
    for i in range(B):
        graph_pool = graph_pool.at[i, i * N_PER:(i + 1) * N_PER].set(1.0)

    params = init_params(jax.random.PRNGKey(1), NUM_LAYERS, NUM_MLP_LAYERS,
                         INPUT_DIM, HIDDEN_DIM, OUTPUT_DIM)

    out = graphcnn_forward(params, x, adj, graph_pool, [N_PER] * B,
                           NUM_LAYERS, NUM_MLP_LAYERS)
    out = jax.block_until_ready(out)

    ref = ref_forward(params, x, adj, graph_pool, NUM_LAYERS, NUM_MLP_LAYERS)
    assert out.shape == (B, OUTPUT_DIM)
    # bf16 neighbor aggregation (per the perf review) => relaxed tolerance vs f32 reference.
    err = float(jnp.max(jnp.abs(out - ref)))
    ref_scale = float(jnp.max(jnp.abs(ref)))
    assert err <= 5e-2 * max(1.0, ref_scale), (err, ref_scale, out, ref)

    # TODO(synk): training-mode F.dropout randomness not reproduced; final_dropout=0.0 makes it identity.
    print("KERNEL_OK")
</pallas_src>

<mosaic_0001>
module attributes {stable_mosaic.version = 11 : i64} {
  func.func @_agg_linear_kernel(%arg0: i32, %arg1: i32, %arg2: memref<2xi32, #tpu.memory_space<smem>>, %arg3: memref<2xi32, #tpu.memory_space<smem>>, %arg4: memref<128x256xbf16, #tpu.memory_space<vmem>>, %arg5: memref<256x128xbf16, #tpu.memory_space<vmem>>, %arg6: memref<128x128xf32, #tpu.memory_space<vmem>>, %arg7: memref<1xf32, #tpu.memory_space<smem>>, %arg8: memref<128x128xf32, #tpu.memory_space<vmem>>, %arg9: memref<1x128xf32, #tpu.memory_space<vmem>>, %arg10: memref<128x128xf32, #tpu.memory_space<vmem>>, %arg11: memref<128x128xf32, #tpu.memory_space<vmem>>) attributes {dimension_semantics = [#tpu.dimension_semantics<parallel>, #tpu.dimension_semantics<arbitrary>], iteration_bounds = array<i64: 2, 1>, scalar_prefetch = 2 : i64, scratch_operands = 1 : i64, tpu.core_type = #tpu.core_type<tc>, window_params = [{transform_indices = @transform_0, window_bounds = array<i64: 128, 256>}, {transform_indices = @transform_1, window_bounds = array<i64: 256, 128>}, {transform_indices = @transform_2, window_bounds = array<i64: 128, 128>}, {transform_indices = @transform_3, window_bounds = array<i64: 1>}, {pipeline_mode = #tpu.pipeline_mode<synchronous>, transform_indices = @transform_4, window_bounds = array<i64: 128, 128>}, {pipeline_mode = #tpu.pipeline_mode<synchronous>, transform_indices = @transform_5, window_bounds = array<i64: 1, 128>}, {transform_indices = @transform_6, window_bounds = array<i64: 128, 128>}]} {
    %c0_i32 = arith.constant 0 : i32
    %0 = arith.cmpi eq, %arg1, %c0_i32 : i32
    %1 = arith.extui %0 : i1 to i32
    %c0_i32_0 = arith.constant 0 : i32
    %2 = arith.cmpi ne, %1, %c0_i32_0 : i32
    scf.if %2 {
      %c0 = arith.constant 0 : index
      %11 = memref.load %arg7[%c0] : memref<1xf32, #tpu.memory_space<smem>>
      %cst = arith.constant 1.000000e+00 : f32
      %12 = arith.addf %cst, %11 : f32
      %c0_4 = arith.constant 0 : index
      %c0_5 = arith.constant 0 : index
      %13 = vector.load %arg6[%c0_4, %c0_5] : memref<128x128xf32, #tpu.memory_space<vmem>>, vector<128x128xf32>
      %14 = vector.broadcast %12 : f32 to vector<128x128xf32>
      %15 = arith.mulf %14, %13 : vector<128x128xf32>
      %c0_6 = arith.constant 0 : index
      %c0_7 = arith.constant 0 : index
      %16 = vector.load %arg11[%c0_6, %c0_7] : memref<128x128xf32, #tpu.memory_space<vmem>>, vector<128x128xf32>
      tpu.vector_store %arg11[%c0_6, %c0_7], %15 {strides = array<i32>} : memref<128x128xf32, #tpu.memory_space<vmem>>, vector<128x128xf32>,
    } else {
    }
    %3 = arith.index_cast %arg0 : i32 to index
    %4 = memref.load %arg3[%3] : memref<2xi32, #tpu.memory_space<smem>>
    %5 = arith.cmpi slt, %arg1, %4 : i32
    %6 = arith.extui %5 : i1 to i32
    %c0_i32_1 = arith.constant 0 : i32
    %7 = arith.cmpi ne, %6, %c0_i32_1 : i32
    scf.if %7 {
      %c0 = arith.constant 0 : index
      %c0_4 = arith.constant 0 : index
      %11 = vector.load %arg11[%c0, %c0_4] : memref<128x128xf32, #tpu.memory_space<vmem>>, vector<128x128xf32>
      %c0_5 = arith.constant 0 : index
      %c0_6 = arith.constant 0 : index
      %12 = vector.load %arg4[%c0_5, %c0_6] : memref<128x256xbf16, #tpu.memory_space<vmem>>, vector<128x256xbf16>
      %c0_7 = arith.constant 0 : index
      %c0_8 = arith.constant 0 : index
      %13 = vector.load %arg5[%c0_7, %c0_8] : memref<256x128xbf16, #tpu.memory_space<vmem>>, vector<256x128xbf16>
      %cst = arith.constant dense<0.000000e+00> : vector<128x128xf32>
      %14 = tpu.matmul %12, %13, %cst {dimension_numbers = #tpu.dot_dimension_numbers<[1], [0], [0], [1], [0, 0, 1, 1], [], []>} : vector<128x256xbf16>, vector<256x128xbf16>, vector<128x128xf32> -> vector<128x128xf32>
      %15 = arith.addf %11, %14 : vector<128x128xf32>
      %c0_9 = arith.constant 0 : index
      %c0_10 = arith.constant 0 : index
      %16 = vector.load %arg11[%c0_9, %c0_10] : memref<128x128xf32, #tpu.memory_space<vmem>>, vector<128x128xf32>
      tpu.vector_store %arg11[%c0_9, %c0_10], %15 {strides = array<i32>} : memref<128x128xf32, #tpu.memory_space<vmem>>, vector<128x128xf32>,
    } else {
    }
    %c0_i32_2 = arith.constant 0 : i32
    %8 = arith.cmpi eq, %arg1, %c0_i32_2 : i32
    %9 = arith.extui %8 : i1 to i32
    %c0_i32_3 = arith.constant 0 : i32
    %10 = arith.cmpi ne, %9, %c0_i32_3 : i32
    scf.if %10 {
      %c0 = arith.constant 0 : index
      %c0_4 = arith.constant 0 : index
      %11 = vector.load %arg11[%c0, %c0_4] : memref<128x128xf32, #tpu.memory_space<vmem>>, vector<128x128xf32>
      %c0_5 = arith.constant 0 : index
      %c0_6 = arith.constant 0 : index
      %12 = vector.load %arg8[%c0_5, %c0_6] : memref<128x128xf32, #tpu.memory_space<vmem>>, vector<128x128xf32>
      %cst = arith.constant dense<0.000000e+00> : vector<128x128xf32>
      %13 = tpu.matmul %11, %12, %cst {dimension_numbers = #tpu.dot_dimension_numbers<[1], [0], [0], [1], [0, 0, 1, 1], [], []>} : vector<128x128xf32>, vector<128x128xf32>, vector<128x128xf32> -> vector<128x128xf32>
      %c0_7 = arith.constant 0 : index
      %c0_8 = arith.constant 0 : index
      %14 = vector.load %arg9[%c0_7, %c0_8] : memref<1x128xf32, #tpu.memory_space<vmem>>, vector<1x128xf32>
      %15 = vector.broadcast %14 : vector<1x128xf32> to vector<128x128xf32>
      %16 = arith.addf %13, %15 : vector<128x128xf32>
      %c128_i32 = arith.constant 128 : i32
      %17 = arith.muli %arg0, %c128_i32 : i32
      %18 = tpu.iota {dimensions = array<i32: 0>} : vector<128x128xi32>
      %19 = vector.broadcast %17 : i32 to vector<128x128xi32>
      %20 = arith.addi %19, %18 : vector<128x128xi32>
      %c160_i32 = arith.constant 160 : i32
      %21 = vector.broadcast %c160_i32 : i32 to vector<128x128xi32>
      %22 = arith.cmpi slt, %20, %21 : vector<128x128xi32>
      %cst_9 = arith.constant 0.000000e+00 : f32
      %23 = vector.broadcast %cst_9 : f32 to vector<128x128xf32>
      %24 = arith.select %22, %16, %23 : vector<128x128xi1>, vector<128x128xf32>
      %c0_10 = arith.constant 0 : index
      %c0_11 = arith.constant 0 : index
      %25 = vector.load %arg10[%c0_10, %c0_11] : memref<128x128xf32, #tpu.memory_space<vmem>>, vector<128x128xf32>
      tpu.vector_store %arg10[%c0_10, %c0_11], %24 {strides = array<i32>} : memref<128x128xf32, #tpu.memory_space<vmem>>, vector<128x128xf32>,
    } else {
    }
    return
  }
  func.func @transform_0(%arg0: i32, %arg1: i32, %arg2: memref<2xi32, #tpu.memory_space<smem>>, %arg3: memref<2xi32, #tpu.memory_space<smem>>) -> (i32, i32) {
    %c1_i32 = arith.constant 1 : i32
    %0 = arith.muli %arg0, %c1_i32 : i32
    %1 = arith.addi %0, %arg1 : i32
    %2 = arith.index_cast %1 : i32 to index
    %3 = memref.load %arg2[%2] : memref<2xi32, #tpu.memory_space<smem>>
    %c0_i32 = arith.constant 0 : i32
    return %arg0, %3 : i32, i32
  }
  func.func @transform_1(%arg0: i32, %arg1: i32, %arg2: memref<2xi32, #tpu.memory_space<smem>>, %arg3: memref<2xi32, #tpu.memory_space<smem>>) -> (i32, i32) {
    %c1_i32 = arith.constant 1 : i32
    %0 = arith.muli %arg0, %c1_i32 : i32
    %1 = arith.addi %0, %arg1 : i32
    %2 = arith.index_cast %1 : i32 to index
    %3 = memref.load %arg2[%2] : memref<2xi32, #tpu.memory_space<smem>>
    %c0_i32 = arith.constant 0 : i32
    %c0_i32_0 = arith.constant 0 : i32
    return %3, %c0_i32 : i32, i32
  }
  func.func @transform_2(%arg0: i32, %arg1: i32, %arg2: memref<2xi32, #tpu.memory_space<smem>>, %arg3: memref<2xi32, #tpu.memory_space<smem>>) -> (i32, i32) {
    %c0_i32 = arith.constant 0 : i32
    %c0_i32_0 = arith.constant 0 : i32
    return %arg0, %c0_i32 : i32, i32
  }
  func.func @transform_3(%arg0: i32, %arg1: i32, %arg2: memref<2xi32, #tpu.memory_space<smem>>, %arg3: memref<2xi32, #tpu.memory_space<smem>>) -> i32 {
    %c0_i32 = arith.constant 0 : i32
    %c0_i32_0 = arith.constant 0 : i32
    return %c0_i32 : i32
  }
  func.func @transform_4(%arg0: i32, %arg1: i32, %arg2: memref<2xi32, #tpu.memory_space<smem>>, %arg3: memref<2xi32, #tpu.memory_space<smem>>) -> (i32, i32) {
    %c0_i32 = arith.constant 0 : i32
    %c0_i32_0 = arith.constant 0 : i32
    %c0_i32_1 = arith.constant 0 : i32
    return %c0_i32, %c0_i32_0 : i32, i32
  }
  func.func @transform_5(%arg0: i32, %arg1: i32, %arg2: memref<2xi32, #tpu.memory_space<smem>>, %arg3: memref<2xi32, #tpu.memory_space<smem>>) -> (i32, i32) {
    %c0_i32 = arith.constant 0 : i32
    %c0_i32_0 = arith.constant 0 : i32
    %c0_i32_1 = arith.constant 0 : i32
    return %c0_i32, %c0_i32_0 : i32, i32
  }
  func.func @transform_6(%arg0: i32, %arg1: i32, %arg2: memref<2xi32, #tpu.memory_space<smem>>, %arg3: memref<2xi32, #tpu.memory_space<smem>>) -> (i32, i32) {
    %c0_i32 = arith.constant 0 : i32
    %c0_i32_0 = arith.constant 0 : i32
    return %arg0, %c0_i32 : i32, i32
  }
}

</mosaic_0001>

<bundles_post_ra>
// kernel: tpu_custom_call.1
= control target key start
LH: loop header
LB: loop body
LE: loop exit
PB: predicated region body
PF: predicated region fallthrough
CT: control target
= control target key end

     0   :  { %s2594_s0 = inlined_call_operand.vmem [shape: s32[2], index: 0, kind: input, shape index: {}]   ;;  %s2595_s2 = inlined_call_operand.hbm [shape: bf16[256,256], index: 2, kind: input, shape index: {}]   ;;  %s2596_s3 = inlined_call_operand.hbm [shape: bf16[256,128], index: 3, kind: input, shape index: {}]   ;;  %s2597_s4 = inlined_call_operand.hbm [shape: f32[256,128], index: 4, kind: input, shape index: {}]   ;;  %s2598_s6 = inlined_call_operand.hbm [shape: f32[128,128], index: 6, kind: input, shape index: {}]   ;;  %s2599_s7 = inlined_call_operand.vmem [shape: f32[1,128], index: 7, kind: input, shape index: {}]   ;;  %s2600_s8 = inlined_call_operand.hbm [shape: f32[256,128], index: 8, kind: output, shape index: {}]   ;;  %s2601_s1 = inlined_call_operand.vmem [shape: s32[2], index: 1, kind: input, shape index: {}]   ;;  %s2602_s5 = inlined_call_operand.<no memory space> [shape: f32[1], index: 5, kind: input, shape index: {}]  }
   0x1   :  { %2622 = sst [smem:[#allocation33_spill]] %s2595_s2  ;;  %s13_s29 = sshll.u32 %s2594_s0, 4  ;;  %s14_s29 = int_to_ptr.vmem [resolvable:$true] %s13_s29 }
   0x2   :  { %2623 = sst [smem:[#allocation34_spill]] %s2596_s3  ;;  %s17_s10 = sshll.u32 %s2601_s1, 4  ;;  %s18_s10 = int_to_ptr.vmem [resolvable:$true] %s17_s10 }
   0x3   :  { %2624 = sst [smem:[#allocation35_spill]] %s2598_s6  ;;  %s1718_s11 = scalar_lea.vmem %s14_s29, 16 }
   0x4   :  { %2625 = sst [smem:[#allocation36_spill]] %s2599_s7  ;;  %p1719_p0 = scmp.ne.s32.totalorder %s14_s29, %s1718_s11 }
   0x5   :  { %2626 = sst [smem:[#allocation37_spill]] %s2600_s8  ;;  %p1723_p1 = scmp.lt.s32.totalorder %s14_s29, %s14_s29 }
   0x6   :  { %p1724_p2 = scmp.lt.s32.totalorder %s1718_s11, %s1718_s11 }
   0x8   :  { %p1725_p3 = por %p1724_p2, %p1723_p1 }
   0xa   :  { %p1726_p4 = pnand %p1725_p3, %p1719_p0 }
   0xc   :  { %1729 = shalt.err (!%p1726_p4)  }
   0xd   :  { %s1996_s12 = smov [#allocation4]   ;;  %s1730_s13 = scalar_lea.vmem %s18_s10, 16 }
   0xe   :  { %16 = dma.vmem_to_smem %s14_s29, 16, %s1996_s12, [#allocation3] }
   0xf   :  { %p1731_p5 = scmp.ne.s32.totalorder %s18_s10, %s1730_s13  ;;  %p1735_p6 = scmp.lt.s32.totalorder %s18_s10, %s18_s10 }
  0x10   :  { %p1736_p7 = scmp.lt.s32.totalorder %s1730_s13, %s1730_s13 }
  0x12   :  { %p1737_p8 = por %p1736_p7, %p1735_p6 }
  0x14   :  { %p1738_p9 = pnand %p1737_p8, %p1731_p5 }
  0x16   :  { %1741 = shalt.err (!%p1738_p9)  }
  0x17   :  { %s1997_s0 = smov [#allocation5]   ;;  %21 = sst [smem:[#allocation6]] %s2602_s5 }
  0x18   :  { %20 = dma.vmem_to_smem %s18_s10, 16, %s1997_s0, [#allocation3] }
  0x19   :  { %1926 = dma.done.wait [#allocation3], 32 }
  0x1a   :  { %1927 = vsyncadd [#allocation3], 4294967264 }
  0x1b   :  { %23 = sfence }
  0x1c   :  { %24 = vsyncpa [#allocation8], 0 }
  0x1d   :  { %26 = vsyncpa [#allocation8 + $0x1], 0 }
  0x1e   :  { %27 = vsyncpa [#allocation11], 0 }
  0x1f   :  { %29 = vsyncpa [#allocation11 + $0x1], 0 }
  0x20   :  { %30 = vsyncpa [#allocation14], 0 }
  0x21   :  { %31 = vsyncpa [#allocation9], 0 }
  0x22   :  { %33 = vsyncpa [#allocation9 + $0x1], 0  ;;  %s2063_s15 = smov 0   ;;  %s2065_s16 = smov 0  }
  0x23   :  { %s2067_s17 = smov 0   ;;  %s2069_s18 = smov 0  }
  0x24   :  { %s2071_s19 = smov 0   ;;  %s2073_s5 = smov 0  }
  0x25   :  { %s2075_s20 = smov 0   ;;  %s2077_s21 = smov 0  }
  0x26   :  { %s2079_s22 = smov 0   ;;  %s2081_s23 = smov 0  }
  0x27   :  { %s2083_s24 = smov 0   ;;  %s2085_s25 = smov 0  }
  0x28 LB: > { %2627 = sst [smem:[#allocation26_spill]] %s1970_s5  ;;  %s51_s26 = sadd.s32 1, %s1990_s24  ;;  %s1994_s25 = sphi %s2085_s25, %s39_s25   ;;  %s1990_s24 = sphi %s2083_s24, %s2693_s24   ;;  %s1986_s23 = sphi %s2081_s23, %s2692_s23   ;;  %s1982_s22 = sphi %s2079_s22, %s2683_s22   ;;  %s1978_s21 = sphi %s2077_s21, %s2691_s21   ;;  %s1974_s20 = sphi %s2075_s20, %s2690_s20   ;;  %s1970_s5 = sphi %s2073_s5, %s2681_s5   ;;  %s1966_s19 = sphi %s2071_s19, %s2689_s19   ;;  %s1962_s18 = sphi %s2069_s18, %s2688_s18   ;;  %s1958_s17 = sphi %s2067_s17, %s2687_s17   ;;  %s1954_s16 = sphi %s2065_s16, %s2686_s16   ;;  %s1950_s15 = sphi %s2063_s15, %s2685_s15  }
  0x29   : > { %2628 = sst [smem:[#allocation27_spill]] %s1982_s22  ;;  %p2606_p10 = scmp.eq.s32.totalorder %s1994_s25, 0 }
  0x2a   : > { %2629 = sst [smem:[#allocation28_spill]] %s1986_s23  ;;  %p53_p11 = scmp.ge.s32.totalorder %s51_s26, 2 }
  0x2b   : > { %s88_s27 = sld [smem:[#allocation4 + %s1990_s24]]  ;;  %s94_s28 = sadd.s32 1, %s1970_s5 }
  0x2c   : > { %p101_p12 = scmp.ne.s32.totalorder %s1970_s5, %s1966_s19  ;;  %s2695_s26 = smov (%p53_p11, %s51_s26), 0 }
  0x2d   : > { %2630 = sst [smem:[#allocation29_spill]] %s2695_s26  ;;  %p107_p0 = scmp.ne.s32.totalorder %s1966_s19, %s1962_s18 }
  0x2e   : > { %p2133_p13 = por %p101_p12, %p2606_p10  ;;  %s90_s30 = sld [smem:[#allocation4 + %s2695_s26]] }
  0x2f   : > { %p2605_p2 = scmp.lt.s32.totalorder %s1994_s25, 2  ;;  %s291_s9 = sand.u32 1, %s1994_s25  }
  0x30   : > { %s293_s10 = sand.u32 1, %s1970_s5   ;;  %s2167_s23 = sadd.s32 4294967295, %s1994_s25  }
  0x31   : > { %s1274_s11 = sshll.u32 %s293_s10, 7  ;;  %p2148_p3 = pnand %p2605_p2, %p2133_p13 }
  0x32   : > { %s1536_s13 = scalar_select %p2133_p13, [#allocation4], [#allocation17] }
  0x33   : > { %s295_s1 = scalar_lea.vmem [#allocation10], %s1274_s11  ;;  %p2608_p5 = scmp.eq.s32.totalorder %s2167_s23, 0 }
  0x34   : > { %s91_s0 = ssub.s32 %s88_s27, %s90_s30  ;;  %s304_s14 = sshll.u32 %s295_s1, 4  ;;  %s2154_s14 = int_to_ptr.vmem [resolvable:$true] %s304_s14 }
  0x35   : > { %p92_p4 = scmp.eq.s32.totalorder %s91_s0, 0  ;;  %s2697_s13 = smov (!%p2605_p2, %s1536_s13), [#allocation19] }
  0x36   : > { %s1537_s10 = scalar_select %p2133_p13, %s1990_s24, 0 }
  0x37   : > { %s2160_s8 = scalar_select %p92_p4, %s1970_s5, %s94_s28  }
  0x38   : > { %s2699_s10 = smov (!%p2605_p2, %s1537_s10), 0  ;;  %p1266_p7 = scmp.ge.s32.totalorder %s1994_s25, 1 }
  0x39   : > { %2633 = sst [smem:[#allocation30_spill]] %s2160_s8  ;;  %p233_p8 = scmp.lt.s32.totalorder %s1994_s25, 3 }
  0x3a   : > { %s297_s7 = sld [smem:[%s2697_s13 + %s2699_s10]]  ;;  %p2178_p9 = por %p107_p0, %p2608_p5 }
  0x3b   : > { %p2182_p11 = pnand %p1266_p7, %p233_p8  ;;  %s1998_s30 = smov [#allocation13]  }
  0x3c   : > { %s2634_s27 = scalar_select %p2178_p9, 1, 0 }
  0x3d   : > { %s2635_s28 = scalar_select %p2182_p11, 1, 0 }
  0x3e   : > { %s2186_s11 = sshll.u32 %s1998_s30, 4  ;;  %s2636_s3 = sld [smem:[#allocation34_spill]]  ;;  %s249_s11 = int_to_ptr.vmem [resolvable:$true] %s2186_s11 }
  0x3f   : > { %s2195_s18 = scalar_lea.sflag [#allocation11], %s291_s9  ;;  %p1744_p0 = pneg %p2148_p3 }
  0x40   : > { %s1328_s29 = sshll.u32 %s297_s7, 11 }
  0x44   : > { %s2191_s1 = scalar_lea.hbm %s2636_s3, %s1328_s29  ;;  %s1747_s8 = scalar_lea.hbm %s2636_s3, 2048 }
  0x45   : > { %s1742_s10 = scalar_lea.hbm %s2191_s1, 2048  ;;  %p1748_p8 = scmp.lt.s32.totalorder %s2191_s1, %s2636_s3 }
  0x46   : > { %p1743_p13 = scmp.ne.s32.totalorder %s2191_s1, %s1742_s10  ;;  %p1749_p1 = scmp.lt.s32.totalorder %s1747_s8, %s1742_s10 }
  0x48   : > { %p1745_p4 = pnand %p1744_p0, %p1743_p13  ;;  %p1750_p6 = por %p1749_p1, %p1748_p8 }
  0x4a   : > { %p1746_p7 = pneg %p1745_p4 }
  0x4c   : > { %p1751_p2 = pnand %p1750_p6, %p1746_p7 }
  0x4e   : > { %1754 = shalt.err (!%p1751_p2)
}
  0x4f   : > { %s1755_s9 = scalar_lea.vmem %s2154_s14, 2048  ;;  %s1999_s0 = smov [#allocation10]  }
  0x50   : > { %p1756_p10 = scmp.ne.s32.totalorder %s2154_s14, %s1755_s9  ;;  %s1760_s5 = sshll.u32 %s1999_s0, 4  ;;  %s1761_s5 = int_to_ptr.vmem [resolvable:$false] %s1760_s5 }
  0x51   : > { %s1762_s7 = scalar_lea.vmem %s1761_s5, 4096  ;;  %p1763_p4 = scmp.lt.s32.totalorder %s2154_s14, %s1761_s5 }
  0x52   : > { %p1758_p12 = pnand %p1756_p10, %p1744_p0  ;;  %p1764_p5 = scmp.lt.s32.totalorder %s1762_s7, %s1755_s9 }
  0x54   : > { %p1759_p13 = pneg %p1758_p12  ;;  %p1765_p9 = por %p1764_p5, %p1763_p4 }
  0x56   : > { %p1766_p11 = pnand %p1765_p9, %p1759_p13 }
  0x58   : > { %1769 = shalt.err (!%p1766_p11)
}
  0x59   : > { %s2000_s8 = smov 64   ;;  %s2001_s10 = smov 4  }
  0x5a   : > { %1561 = dma.hbm_to_vmem [thread:$0]  (!%p2148_p3), %s2191_s1, 2048, %s2154_s14, %s2195_s18, %s2000_s8, %s2000_s8, %s2001_s10  }
  0x5b   : > { %p2637_p10 = scmp.eq.s32.totalorder %s2167_s23, 0  ;;  %p2638_p1 = scmp.ne.s32.totalorder %s2635_s28, 0 }
  0x5c   : > { %s1781_s5 = scalar_lea.vmem %s249_s11, 2048  ;;  %p1789_p0 = scmp.lt.s32.totalorder %s249_s11, %s249_s11 }
  0x5d   : > { %p2639_p2 = pneg %p2638_p1  ;;  %p1782_p5 = scmp.ne.s32.totalorder %s249_s11, %s1781_s5 }
  0x5e   : > { %p1790_p7 = scmp.lt.s32.totalorder %s1781_s5, %s1781_s5 }
  0x5f   : > { %p1548_p6 = pnand %p2639_p2, %p2637_p10 }
  0x60   : > { %p1791_p8 = por %p1790_p7, %p1789_p0 }
  0x61   : > { %p1772_p12 = pneg %p1548_p6 }
  0x63   : > { %p1784_p9 = pnand %p1782_p5, %p1772_p12 }
  0x65   : > { %p1785_p11 = pneg %p1784_p9 }
  0x67   : > { %p1792_p13 = pnand %p1791_p8, %p1785_p11 }
  0x69   : > { %1795 = shalt.err (!%p1792_p13)
}
  0x6a   : > { %s2612_s30 = smov 128   ;;  %s2614_s12 = smov 8  }
  0x6b   : > { %s2640_s6 = sld [smem:[#allocation35_spill]]  ;;  %s59_s9 = ssub.s32 %s1990_s24, %s2695_s26 }
  0x6c   : > { %s56_s13 = sld [smem:[#allocation4 + %s1990_s24]]  ;;  %s64_s0 = sadd.s32 1, %s1982_s22 }
  0x6d   : > { %s58_s29 = sld [smem:[#allocation4 + %s2695_s26]]  ;;  %p71_p3 = scmp.ne.s32.totalorder %s1982_s22, %s1978_s21 }
  0x6e   : > { %p77_p4 = scmp.ne.s32.totalorder %s1978_s21, %s1974_s20  ;;  %p118_p10 = scmp.eq.s32.totalorder %s59_s9, 0 }
  0x6f   : > { %p2641_p2 = scmp.eq.s32.totalorder %s1994_s25, 0  ;;  %s1327_s10 = sshll.u32 %s1990_s24, 5 }
  0x70   : > { %p2646_p11 = scmp.lt.s32.totalorder %s1994_s25, 2  ;;  %p127_p13 = scmp.ne.s32.totalorder %s1958_s17, %s1954_s16 }
  0x71   : > { %1550 = dma.hbm_to_vmem [thread:$0]  (!%p1548_p6), %s2640_s6, 2048, %s249_s11, [#allocation14], %s2612_s30, %s2612_s30, %s2614_s12  }
  0x72   : > { %p2239_p12 = por %p2641_p2, %p71_p3  ;;  %s265_s11 = sand.u32 1, %s1982_s22  }
  0x73   : > { %p2643_p6 = scmp.eq.s32.totalorder %s2167_s23, 0  ;;  %s1269_s20 = sshll.u32 %s265_s11, 7 }
  0x74   : > { %s60_s5 = ssub.s32 %s56_s13, %s58_s29  ;;  %s269_s1 = scalar_lea.vmem [#allocation7], %s1269_s20 }
  0x75   : > { %p2246_p5 = por %p2643_p6, %p77_p4  ;;  %s61_s14 = sor.u32 %s60_s5, %s59_s9 }
  0x76   : > { %s281_s30 = sshll.u32 %s269_s1, 4  ;;  %p62_p9 = scmp.eq.s32.totalorder %s61_s14, 0  ;;  %s2251_s30 = int_to_ptr.vmem [resolvable:$true] %s281_s30 }
  0x77   : > { %s2644_s8 = scalar_select %p2246_p5, 1, 0 }
  0x78   : > { %s1533_s12 = scalar_select %p2239_p12, [#allocation4], [#allocation16] }
  0x79   : > { %s2256_s3 = scalar_select %p62_p9, %s1982_s22, %s64_s0  }
  0x7a   : > { %s1534_s6 = scalar_select %p2239_p12, %s1990_s24, 0 }
  0x7b   : > { %2645 = sst [smem:[#allocation31_spill]] %s2256_s3  ;;  %s2701_s12 = smov (!%p2646_p11, %s1533_s12), [#allocation18] }
  0x7c   : > { %p2647_p0 = pmov %p2646_p11  ;;  %s120_s0 = sadd.s32 1, %s1958_s17 }
  0x7d   : > { %s2279_s5 = scalar_select %p118_p10, %s1958_s17, %s120_s0  }
  0x7e   : > { %s2703_s6 = smov (!%p2647_p0, %s1534_s6), 0  ;;  %p2648_p7 = pmov %p2647_p0 }
  0x7f   : > { %s271_s29 = sld [smem:[%s2701_s12 + %s2703_s6]]  ;;  %p2651_p3 = pmov %p2641_p2 }
  0x80   : > { %p2269_p8 = pnand %p2648_p7, %p2239_p12  ;;  %2650 = sst [smem:[#allocation32_spill]] %s2279_s5 }
  0x81   : > { %p2283_p4 = por %p127_p13, %p2651_p3  ;;  %p2617_p2 = scmp.ne.s32.totalorder %s1954_s16, %s1950_s15 }
  0x82   : > { %p2653_p12 = scmp.eq.s32.totalorder %s2167_s23, 1  ;;  %s2655_s2 = sld [smem:[#allocation33_spill]] }
  0x83   : > { %s2652_s1 = scalar_select %p2283_p4, 1, 0 }
  0x84   : > { %p2291_p6 = por %p2653_p12, %p127_p13  ;;  %p2656_p10 = scmp.eq.s32.totalorder %s2167_s23, 0 }
  0x85   : > { %s1271_s14 = sshll.u32 %s271_s29, 1  ;;  %p1798_p0 = pneg %p2269_p8 }
  0x86   : > { %s278_s7 = sadd.s32 %s1327_s10, %s1271_s14  ;;  %p2305_p9 = por %p2617_p2, %p2656_p10 }
  0x87   : > { %s1273_s26 = sshll.u32 %s278_s7, 6  ;;  %s2309_s10 = scalar_lea.sflag [#allocation8], %s265_s11 }
  0x88   : > { %s2654_s3 = scalar_select %p2291_p6, 1, 0 }
  0x89   : > { %s2298_s9 = scalar_lea.hbm %s2655_s2, %s1273_s26  ;;  %s1801_s7 = scalar_lea.hbm %s2655_s2, 4096 }
  0x8a   : > { %s2657_s29 = scalar_select %p2305_p9, 1, 0 }
  0x8b   : > { %s1796_s0 = scalar_lea.hbm %s2298_s9, 2048  ;;  %p1802_p3 = scmp.lt.s32.totalorder %s2298_s9, %s2655_s2 }
  0x8c   : > { %p1797_p11 = scmp.ne.s32.totalorder %s2298_s9, %s1796_s0  ;;  %p1803_p12 = scmp.lt.s32.totalorder %s1801_s7, %s1796_s0 }
  0x8e   : > { %p1799_p7 = pnand %p1798_p0, %p1797_p11  ;;  %p1804_p10 = por %p1803_p12, %p1802_p3 }
  0x90   : > { %p1800_p13 = pneg %p1799_p7 }
  0x92   : > { %p1805_p2 = pnand %p1804_p10, %p1800_p13 }
  0x94   : > { %1808 = shalt.err (!%p1805_p2)
}
  0x95   : > { %s1809_s11 = scalar_lea.vmem %s2251_s30, 2048  ;;  %s2004_s20 = smov [#allocation7]  }
  0x96   : > { %p1810_p6 = scmp.ne.s32.totalorder %s2251_s30, %s1809_s11  ;;  %s1814_s22 = sshll.u32 %s2004_s20, 4  ;;  %s1815_s22 = int_to_ptr.vmem [resolvable:$false] %s1814_s22 }
  0x97   : > { %s1816_s14 = scalar_lea.vmem %s1815_s22, 4096  ;;  %p1817_p7 = scmp.lt.s32.totalorder %s2251_s30, %s1815_s22 }
  0x98   : > { %p1812_p9 = pnand %p1810_p6, %p1798_p0  ;;  %p1818_p5 = scmp.lt.s32.totalorder %s1816_s14, %s1809_s11 }
  0x9a   : > { %p1813_p11 = pneg %p1812_p9  ;;  %p1819_p1 = por %p1818_p5, %p1817_p7 }
  0x9c   : > { %p1820_p4 = pnand %p1819_p1, %p1813_p11 }
  0x9e   : > { %1823 = shalt.err (!%p1820_p4)
}
  0x9f   : > { %s2658_s0 = smov 8   ;;  %s2659_s26 = smov 128  }
  0xa0   : > { %1556 = dma.hbm_to_vmem [thread:$0]  (!%p2269_p8), %s2298_s9, 2048, %s2251_s30, %s2309_s10, %s2659_s26, %s2659_s26, %s2658_s0  }
  0xa1   : > { %s2660_s22 = sadd.s32 4294967294, %s1994_s25   ;;  %s316_s20 = sand.u32 1, %s1958_s17  }
  0xa2   : > { %p226_p5 = scmp.eq.s32.totalorder %s2660_s22, 1  ;;  %s1277_s7 = sshll.u32 %s316_s20, 7 }
  0xa3   : > { %s1329_s6 = sshll.u32 %s1990_s24, 11  ;;  %p2661_p1 = scmp.ne.s32.totalorder %s1954_s16, %s1950_s15 }
  0xa4   : > { %s324_s14 = scalar_lea.hbm %s2597_s4, %s1329_s6  ;;  %s318_s2 = scalar_lea.vmem [#allocation12], %s1277_s7 }
  0xa5   : > { %p2340_p4 = por %p226_p5, %p2661_p1  ;;  %s325_s5 = sshll.u32 %s318_s2, 4  ;;  %s326_s5 = int_to_ptr.vmem [resolvable:$true] %s325_s5 }
  0xa6   : > { %p2663_p2 = scmp.ne.s32.totalorder %s2652_s1, 0  ;;  %p2664_p6 = scmp.lt.s32.totalorder %s1994_s25, 2 }
  0xa7   : > { %s1837_s9 = scalar_lea.vmem %s326_s5, 2048  ;;  %s2005_s10 = smov [#allocation12]  }
  0xa8   : > { %p2351_p8 = pnand %p2664_p6, %p2663_p2  ;;  %p1838_p0 = scmp.ne.s32.totalorder %s326_s5, %s1837_s9 }
  0xa9   : > { %s1842_s22 = sshll.u32 %s2005_s10, 4  ;;  %s1843_s22 = int_to_ptr.vmem [resolvable:$false] %s1842_s22 }
  0xaa   : > { %p1826_p9 = pneg %p2351_p8  ;;  %s1844_s20 = scalar_lea.vmem %s1843_s22, 4096 }
  0xab   : > { %p1845_p12 = scmp.lt.s32.totalorder %s326_s5, %s1843_s22  ;;  %p1846_p10 = scmp.lt.s32.totalorder %s1844_s20, %s1837_s9 }
  0xac   : > { %p1840_p13 = pnand %p1838_p0, %p1826_p9 }
  0xad   : > { %p1847_p11 = por %p1846_p10, %p1845_p12 }
  0xae   : > { %p1841_p3 = pneg %p1840_p13 }
  0xb0   : > { %p1848_p7 = pnand %p1847_p11, %p1841_p3 }
  0xb2   : > { %1851 = shalt.err (!%p1848_p7)
}
  0xb3   : > { %1564 = dma.hbm_to_vmem [thread:$0]  (!%p2351_p8), %s324_s14, 2048, %s326_s5, %s2195_s18, %s2659_s26, %s2659_s26, %s2658_s0  }
  0xb4   : > { %p2666_p5 = scmp.ne.s32.totalorder %s2635_s28, 0 }
  0xb5   : > { %s339_s2 = sand.u32 (!%p2666_p5), 1, %s1978_s21   ;;  %p2667_p1 = scmp.ne.s32.totalorder (!%p2666_p5), %s2644_s8, 0 }
  0xb6   : > { %337 = sbr.rel (%p2666_p5) target bundleno = 739 (0x2e3), region = 44  ;;  %s1281_s1 = sshll.u32 (!%p2666_p5), %s339_s2, 7 }
  0xb7   : > { %s340_s7 = scalar_lea.sflag (!%p2666_p5), [#allocation8], %s339_s2  ;;  %s2366_s6 = scalar_lea.vmem (!%p2666_p5), [#allocation7], %s1281_s1 }
  0xbb   : > { %1929 = dma.done.wait (%p2667_p1), %s340_s7, 2048  }
  0xbc   : > { %1931 = vsyncadd (%p2667_p1), %s340_s7, 4294965248  ;;  %s348_s12 = sand.u32 1, %s2167_s23   ;;  %s350_s18 = sand.u32 1, %s1966_s19  }
  0xbd   : > { %s1282_s5 = sshll.u32 %s350_s18, 7  ;;  %s349_s28 = scalar_lea.sflag [#allocation11], %s348_s12 }
  0xbe   : > { %s2374_s0 = scalar_lea.vmem [#allocation10], %s1282_s5  ;;  %p2668_p2 = scmp.ne.s32.totalorder %s2634_s27, 0 }
  0xc0   : > { %1933 = dma.done.wait (%p2668_p2), %s349_s28, 2048  }
  0xc1   : > { %1935 = vsyncadd (%p2668_p2), %s349_s28, 4294965248  ;;  %s359_s26 = sand.u32 1, %s1954_s16   ;;  %p2669_p6 = scmp.ne.s32.totalorder %s2657_s29, 0 }
  0xc2   : > { %s2383_s8 = sshll.u32 %s359_s26, 7 }
  0xc3   : > { %s2386_s11 = scalar_lea.vmem [#allocation12], %s2383_s8 }
  0xc4   : > { %1937 = dma.done.wait (%p2669_p6), %s349_s28, 2048  }
  0xc5   : > { %1939 = vsyncadd (%p2669_p6), %s349_s28, 4294965248  ;;  %p2670_p8 = scmp.eq.s32.totalorder %s2167_s23, 0 }
  0xc7   : > { %1941 = dma.done.wait (%p2670_p8), [#allocation14], 2048   ;;  %p2671_p9 = pmov %p2670_p8 }
  0xc8   : > { %s2672_s27 = sld [smem:[#allocation28_spill]]  ;;  %v420_v0 = vld [vmem:[%s2386_s11] sm:$0xff]  ;;  %v421_v1 = vld [vmem:[%s2386_s11 + $0x8] sm:$0xff]  ;;  %v422_v2 = vld [vmem:[%s2386_s11 + $0x10] sm:$0xff]  ;;  %s2416_s30 = scalar_lea.vmem [#allocation15], %s2383_s8 }
  0xc9   : > { %1943 = vsyncadd (%p2671_p9), [#allocation14], 4294965248  ;;  %s418_s14 = sld [smem:[#allocation6]]  ;;  %v423_v3 = vld [vmem:[%s2386_s11 + $0x18] sm:$0xff]  ;;  %v424_v4 = vld [vmem:[%s2386_s11 + $0x20] sm:$0xff] }
  0xca   : > { %v425_v5 = vld [vmem:[%s2386_s11 + $0x28] sm:$0xff]  ;;  %v426_v6 = vld [vmem:[%s2386_s11 + $0x30] sm:$0xff]  ;;  %v427_v7 = vld [vmem:[%s2386_s11 + $0x38] sm:$0xff] }
  0xcb   : > { %v428_v8 = vld [vmem:[%s2386_s11 + $0x40] sm:$0xff]  ;;  %v429_v10 = vld [vmem:[%s2386_s11 + $0x48] sm:$0xff]  ;;  %v430_v11 = vld [vmem:[%s2386_s11 + $0x50] sm:$0xff] }
  0xcc   : > { %v431_v12 = vld [vmem:[%s2386_s11 + $0x58] sm:$0xff]  ;;  %v432_v17 = vld [vmem:[%s2386_s11 + $0x60] sm:$0xff]  ;;  %v433_v18 = vld [vmem:[%s2386_s11 + $0x68] sm:$0xff] }
  0xcd   : > { %v434_v19 = vld [vmem:[%s2386_s11 + $0x70] sm:$0xff]  ;;  %v435_v24 = vld [vmem:[%s2386_s11 + $0x78] sm:$0xff] }
  0xce   : > { %s2397_s29 = sld [smem:[#allocation5 + %s2672_s27]] }
  0xcf   : > { %s419_s23 = sadd.f32 1.0, %s418_s14 }
  0xd1   : > { %v436_v9 = vstv %s419_s23 }
  0xd2   : > { %v437_v13 = vmul.f32 %v436_v9, %v420_v0  ;;  %v438_v14 = vmul.f32 %v436_v9, %v421_v1  ;;  %v439_v15 = vmul.f32 %v436_v9, %v422_v2  ;;  %v440_v16 = vmul.f32 %v436_v9, %v423_v3 }
  0xd3   : > { %v441_v20 = vmul.f32 %v436_v9, %v424_v4  ;;  %v442_v21 = vmul.f32 %v436_v9, %v425_v5  ;;  %v443_v22 = vmul.f32 %v436_v9, %v426_v6  ;;  %v444_v23 = vmul.f32 %v436_v9, %v427_v7 }
  0xd4   : > { %453 = vst [vmem:[#allocation2 + $0x30] sm:$0xff] %v437_v13  ;;  %454 = vst [vmem:[#allocation2] sm:$0xff] %v438_v14  ;;  %v445_v25 = vmul.f32 %v436_v9, %v428_v8  ;;  %v446_v26 = vmul.f32 %v436_v9, %v429_v10  ;;  %v447_v27 = vmul.f32 %v436_v9, %v430_v11  ;;  %p1287_p0 = scmp.le.s32.totalorder %s2397_s29, 0 }
  0xd5   : > { %455 = vst [vmem:[#allocation2 + $0x58] sm:$0xff] %v439_v15  ;;  %456 = vst [vmem:[#allocation2 + $0x18] sm:$0xff] %v440_v16  ;;  %v448_v28 = vmul.f32 %v436_v9, %v431_v12  ;;  %v449_v29 = vmul.f32 %v436_v9, %v432_v17  ;;  %v450_v30 = vmul.f32 %v436_v9, %v433_v18 }
  0xd6   : > { %457 = vst [vmem:[#allocation2 + $0x50] sm:$0xff] %v441_v20  ;;  %458 = vst [vmem:[#allocation2 + $0x68] sm:$0xff] %v442_v21  ;;  %v451_v31 = vmul.f32 %v436_v9, %v434_v19  ;;  %v452_v32 = vmul.f32 %v436_v9, %v435_v24 }
  0xd7   : > { %459 = vst [vmem:[#allocation2 + $0x8] sm:$0xff] %v443_v22  ;;  %460 = vst [vmem:[#allocation2 + $0x48] sm:$0xff] %v444_v23  ;;  %473 = sbr.rel (%p1287_p0) target bundleno = 481 (0x1e1), region = 68 }
  0xd8   : > { %461 = vst [vmem:[#allocation2 + $0x40] sm:$0xff] %v445_v25  ;;  %462 = vst [vmem:[#allocation2 + $0x20] sm:$0xff] %v446_v26 }
  0xd9   : > { %463 = vst [vmem:[#allocation2 + $0x10] sm:$0xff] %v447_v27  ;;  %464 = vst [vmem:[#allocation2 + $0x38] sm:$0xff] %v448_v28 }
  0xda   : > { %465 = vst [vmem:[#allocation2 + $0x60] sm:$0xff] %v449_v29  ;;  %466 = vst [vmem:[#allocation2 + $0x70] sm:$0xff] %v450_v30 }
  0xdb   : > { %467 = vst [vmem:[#allocation2 + $0x78] sm:$0xff] %v451_v31  ;;  %468 = vst [vmem:[#allocation2 + $0x28] sm:$0xff] %v452_v32 }
  0xdc   : > { %v1678_v33 = vld [vmem:[%s2374_s0 + $0x78] sm:$0xff]   ;;  %v1680_v35 = vld [vmem:[%s2374_s0 + $0x70] sm:$0xff]   ;;  %v1682_v37 = vld [vmem:[%s2374_s0 + $0x68] sm:$0xff]  }
  0xdd   : > { %v1679_v34 = vld [vmem:[%s2374_s0 + $0x38] sm:$0xff]   ;;  %1331 = vmatprep.subr.bf16.mxu0 %v1678_v33  ;;  %1483 = vmatprep.subr.bf16.mxu1 %v1678_v33  ;;  %v1681_v36 = vld [vmem:[%s2374_s0 + $0x30] sm:$0xff]   ;;  %v1683_v38 = vld [vmem:[%s2374_s0 + $0x28] sm:$0xff]  }
  0xde   : > { %1332 = vmatpush3.bf16.msra.mxu0 %v1679_v34  ;;  %1491 = vmatpush3.bf16.msra.mxu1 %v1679_v34  ;;  %v1684_v39 = vld [vmem:[%s2374_s0 + $0x60] sm:$0xff]   ;;  %v1686_v41 = vld [vmem:[%s2374_s0 + $0x58] sm:$0xff]   ;;  %v1688_v43 = vld [vmem:[%s2374_s0 + $0x50] sm:$0xff]  }
  0xdf   : > { %1333 = vmatprep.subr.bf16.mxu0 %v1680_v35  ;;  %1484 = vmatprep.subr.bf16.mxu1 %v1680_v35  ;;  %v1685_v40 = vld [vmem:[%s2374_s0 + $0x20] sm:$0xff]   ;;  %v1687_v42 = vld [vmem:[%s2374_s0 + $0x18] sm:$0xff]   ;;  %v1689_v46 = vld [vmem:[%s2374_s0 + $0x10] sm:$0xff]  }
  0xe0   : > { %v1696_v44 = vld [vmem:[%s2366_s6 + $0x4] ss:$8 sps:$4 sm:$0xff]   ;;  %v1694_v51 = vld [vmem:[%s2366_s6] ss:$8 sps:$4 sm:$0xff]   ;;  %v1700_v53 = vld [vmem:[%s2366_s6 + $0x14] ss:$8 sps:$4 sm:$0xff]  }
  0xe1   : > { %v1699_v45 = vld [vmem:[%s2366_s6 + $0x44] ss:$8 sps:$4 sm:$0xff]   ;;  %746 = vmatprep.mubr.bf16.mxu0 %v1696_v44  ;;  %v1697_v52 = vld [vmem:[%s2366_s6 + $0x40] ss:$8 sps:$4 sm:$0xff]   ;;  %v1702_v54 = vld [vmem:[%s2366_s6 + $0x54] ss:$8 sps:$4 sm:$0xff]  }
  0xe2   : > { %1334 = vmatpush3.bf16.msra.mxu0 %v1681_v36  ;;  %1492 = vmatpush3.bf16.msra.mxu1 %v1681_v36  ;;  %v1690_v47 = vld [vmem:[%s2374_s0 + $0x48] sm:$0xff]   ;;  %v1692_v49 = vld [vmem:[%s2374_s0 + $0x40] sm:$0xff]   ;;  %v1704_v55 = vld [vmem:[%s2366_s6 + $0x10] ss:$8 sps:$4 sm:$0xff]  }
  0xe3   : > { %1335 = vmatprep.subr.bf16.mxu0 %v1682_v37  ;;  %1485 = vmatprep.subr.bf16.mxu1 %v1682_v37  ;;  %v1691_v48 = vld [vmem:[%s2374_s0 + $0x8] sm:$0xff]   ;;  %v1693_v50 = vld [vmem:[%s2374_s0] sm:$0xff]   ;;  %v1705_v56 = vld [vmem:[%s2366_s6 + $0x50] ss:$8 sps:$4 sm:$0xff]  }
  0xe4   : > { %778 = vmatprep.mubr.bf16.mxu1 %v1699_v45  ;;  %v1706_v57 = vld [vmem:[%s2366_s6 + $0x24] ss:$8 sps:$4 sm:$0xff]   ;;  %v1710_v59 = vld [vmem:[%s2366_s6 + $0x20] ss:$8 sps:$4 sm:$0xff]   ;;  %v1712_v61 = vld [vmem:[%s2366_s6 + $0x34] ss:$8 sps:$4 sm:$0xff]  }
  0xe5   : > { %v1708_v58 = vld [vmem:[%s2366_s6 + $0x64] ss:$8 sps:$4 sm:$0xff]   ;;  %v1711_v60 = vld [vmem:[%s2366_s6 + $0x60] ss:$8 sps:$4 sm:$0xff]   ;;  %v1714_v62 = vld [vmem:[%s2366_s6 + $0x74] ss:$8 sps:$4 sm:$0xff]  }
  0xe6   : > { %1336 = vmatpush3.bf16.msra.mxu0 %v1683_v38  ;;  %1493 = vmatpush3.bf16.msra.mxu1 %v1683_v38  ;;  %v1716_v63 = vld [vmem:[%s2366_s6 + $0x30] ss:$8 sps:$4 sm:$0xff]   ;;  %v482_v5 = vld [vmem:[#allocation2 + $0x40] sm:$0xff] }
  0xe7   : > { %1337 = vmatprep.subr.bf16.mxu0 %v1684_v39  ;;  %1486 = vmatprep.subr.bf16.mxu1 %v1684_v39  ;;  %v1717_v0 = vld [vmem:[%s2366_s6 + $0x70] ss:$8 sps:$4 sm:$0xff]   ;;  %v475_v13 = vld [vmem:[#allocation2] sm:$0xff] }
  0xe8   : > { %v474_v3 = vld [vmem:[#allocation2 + $0x30] sm:$0xff]  ;;  %v483_v15 = vld [vmem:[#allocation2 + $0x20] sm:$0xff]  ;;  %v476_v23 = vld [vmem:[#allocation2 + $0x58] sm:$0xff] }
  0xe9   : > { %v484_v25 = vld [vmem:[#allocation2 + $0x10] sm:$0xff]  ;;  %v477_v33 = vld [vmem:[#allocation2 + $0x18] sm:$0xff]  ;;  %v486_v45 = vld [vmem:[#allocation2 + $0x60] sm:$0xff] }
  0xea   : > { %1338 = vmatpush3.bf16.msra.mxu0 %v1685_v40  ;;  %1494 = vmatpush3.bf16.msra.mxu1 %v1685_v40  ;;  %v485_v35 = vld [vmem:[#allocation2 + $0x38] sm:$0xff] }
  0xeb   : > { %1339 = vmatprep.subr.bf16.mxu0 %v1686_v41  ;;  %1487 = vmatprep.subr.bf16.mxu1 %v1686_v41 }
  0xee   : > { %1340 = vmatpush3.bf16.msra.mxu0 %v1687_v42  ;;  %1495 = vmatpush3.bf16.msra.mxu1 %v1687_v42 }
  0xef   : > { %1341 = vmatprep.subr.bf16.mxu0 %v1688_v43  ;;  %1488 = vmatprep.subr.bf16.mxu1 %v1688_v43  ;;  %v478_v43 = vld [vmem:[#allocation2 + $0x50] sm:$0xff] }
  0xf2   : > { %1342 = vmatpush3.bf16.msra.mxu0 %v1689_v46  ;;  %1496 = vmatpush3.bf16.msra.mxu1 %v1689_v46 }
  0xf3   : > { %1343 = vmatprep.subr.bf16.mxu0 %v1690_v47  ;;  %1489 = vmatprep.subr.bf16.mxu1 %v1690_v47 }
  0xf6   : > { %1344 = vmatpush3.bf16.msra.mxu0 %v1691_v48  ;;  %1497 = vmatpush3.bf16.msra.mxu1 %v1691_v48 }
  0xf7   : > { %1345 = vmatprep.subr.bf16.mxu0 %v1692_v49  ;;  %1490 = vmatprep.subr.bf16.mxu1 %v1692_v49 }
  0xfa   : > { %1346 = vmatpush3.bf16.msra.mxu0 %v1693_v50  ;;  %1498 = vmatpush3.bf16.msra.mxu1 %v1693_v50 }
  0xfd   : > { %747 = vmatmul.mubr.bf16.vlgmr.msra.gmra.mxu0 %v1694_v51  ;;  %779 = vmatmul.mubr.bf16.vlgmr.msra.gmra.mxu1 %v1697_v52 }
  0xfe   : > { %754 = vmatprep.mubr.bf16.mxu0 %v1700_v53  ;;  %786 = vmatprep.mubr.bf16.mxu1 %v1702_v54  ;;  %v479_v53 = vld [vmem:[#allocation2 + $0x68] sm:$0xff] }
 0x105   : > { %755 = vmatmul.mubr.bf16.gmra.mxu0 %v1704_v55  ;;  %787 = vmatmul.mubr.bf16.gmra.mxu1 %v1705_v56  ;;  %v487_v55 = vld [vmem:[#allocation2 + $0x70] sm:$0xff] }
 0x106   : > { %762 = vmatprep.mubr.bf16.mxu0 %v1706_v57  ;;  %794 = vmatprep.mubr.bf16.mxu1 %v1708_v58 }
 0x10d   : > { %763 = vmatmul.mubr.bf16.gmra.mxu0 %v1710_v59  ;;  %795 = vmatmul.mubr.bf16.gmra.mxu1 %v1711_v60 }
 0x10e   : > { %770 = vmatprep.mubr.bf16.mxu0 %v1712_v61  ;;  %802 = vmatprep.mubr.bf16.mxu1 %v1714_v62 }
 0x115   : > { %771 = vmatmul.mubr.bf16.gmra.mxu0 %v1716_v63  ;;  %803 = vmatmul.mubr.bf16.gmra.mxu1 %v1717_v0  ;;  %v480_v63 = vld [vmem:[#allocation2 + $0x8] sm:$0xff] }
 0x1bd   : > { %v1347_v1 = vpop.f32.mrf.mxu0  ;;  %v1371_v2 = vpop.f32.mrf.mxu1 }
 0x1bf   : > { %v1348_v4 = vpop.f32.mrf.mxu0  ;;  %v1372_v6 = vpop.f32.mrf.mxu1 }
 0x1c0   : > { %v1349_v7 = vadd.f32 %v1348_v4, %v1347_v1  ;;  %v1373_v8 = vadd.f32 %v1372_v6, %v1371_v2  ;;  %v488_v1 = vld [vmem:[#allocation2 + $0x78] sm:$0xff] }
 0x1c1   : > { %v1350_v9 = vpop.f32.mrf.mxu0  ;;  %v1374_v10 = vpop.f32.mrf.mxu1 }
 0x1c2   : > { %v811_v11 = vadd.f32 %v1349_v7, %v474_v3  ;;  %v819_v12 = vadd.f32 %v1373_v8, %v482_v5 }
 0x1c3   : > { %v1351_v14 = vpop.f32.mrf.mxu0  ;;  %v1375_v16 = vpop.f32.mrf.mxu1 }
 0x1c4   : > { %827 = vst [vmem:[#allocation2 + $0x30] sm:$0xff] %v811_v11  ;;  %835 = vst [vmem:[#allocation2 + $0x40] sm:$0xff] %v819_v12  ;;  %v1352_v17 = vadd.f32 %v1351_v14, %v1350_v9  ;;  %v1376_v18 = vadd.f32 %v1375_v16, %v1374_v10  ;;  %v481_v9 = vld [vmem:[#allocation2 + $0x48] sm:$0xff] }
 0x1c5   : > { %v1353_v19 = vpop.f32.mrf.mxu0  ;;  %v1377_v20 = vpop.f32.mrf.mxu1  ;;  %v489_v11 = vld [vmem:[#allocation2 + $0x28] sm:$0xff] }
 0x1c6   : > { %v812_v21 = vadd.f32 %v1352_v17, %v475_v13  ;;  %v820_v22 = vadd.f32 %v1376_v18, %v483_v15 }
 0x1c7   : > { %v1354_v24 = vpop.f32.mrf.mxu0  ;;  %v1378_v26 = vpop.f32.mrf.mxu1 }
 0x1c8   : > { %828 = vst [vmem:[#allocation2] sm:$0xff] %v812_v21  ;;  %836 = vst [vmem:[#allocation2 + $0x20] sm:$0xff] %v820_v22  ;;  %v1355_v27 = vadd.f32 %v1354_v24, %v1353_v19  ;;  %v1379_v28 = vadd.f32 %v1378_v26, %v1377_v20 }
 0x1c9   : > { %v1356_v29 = vpop.f32.mrf.mxu0  ;;  %v1380_v30 = vpop.f32.mrf.mxu1 }
 0x1ca   : > { %v813_v31 = vadd.f32 %v1355_v27, %v476_v23  ;;  %v821_v32 = vadd.f32 %v1379_v28, %v484_v25 }
 0x1cb   : > { %v1357_v34 = vpop.f32.mrf.mxu0  ;;  %v1381_v36 = vpop.f32.mrf.mxu1 }
 0x1cc   : > { %829 = vst [vmem:[#allocation2 + $0x58] sm:$0xff] %v813_v31  ;;  %837 = vst [vmem:[#allocation2 + $0x10] sm:$0xff] %v821_v32  ;;  %v1358_v37 = vadd.f32 %v1357_v34, %v1356_v29  ;;  %v1382_v38 = vadd.f32 %v1381_v36, %v1380_v30 }
 0x1cd   : > { %v1359_v39 = vpop.f32.mrf.mxu0  ;;  %v1383_v40 = vpop.f32.mrf.mxu1 }
 0x1ce   : > { %v814_v41 = vadd.f32 %v1358_v37, %v477_v33  ;;  %v822_v42 = vadd.f32 %v1382_v38, %v485_v35 }
 0x1cf   : > { %v1360_v44 = vpop.f32.mrf.mxu0  ;;  %v1384_v46 = vpop.f32.mrf.mxu1 }
 0x1d0   : > { %830 = vst [vmem:[#allocation2 + $0x18] sm:$0xff] %v814_v41  ;;  %838 = vst [vmem:[#allocation2 + $0x38] sm:$0xff] %v822_v42  ;;  %v1361_v47 = vadd.f32 %v1360_v44, %v1359_v39  ;;  %v1385_v48 = vadd.f32 %v1384_v46, %v1383_v40 }
 0x1d1   : > { %v1362_v49 = vpop.f32.mrf.mxu0  ;;  %v1386_v50 = vpop.f32.mrf.mxu1 }
 0x1d2   : > { %v815_v51 = vadd.f32 %v1361_v47, %v478_v43  ;;  %v823_v52 = vadd.f32 %v1385_v48, %v486_v45 }
 0x1d3   : > { %v1363_v54 = vpop.f32.mrf.mxu0  ;;  %v1387_v56 = vpop.f32.mrf.mxu1 }
 0x1d4   : > { %831 = vst [vmem:[#allocation2 + $0x50] sm:$0xff] %v815_v51  ;;  %839 = vst [vmem:[#allocation2 + $0x60] sm:$0xff] %v823_v52  ;;  %v1364_v57 = vadd.f32 %v1363_v54, %v1362_v49  ;;  %v1388_v58 = vadd.f32 %v1387_v56, %v1386_v50 }
 0x1d5   : > { %v1365_v59 = vpop.f32.mrf.mxu0  ;;  %v1389_v60 = vpop.f32.mrf.mxu1 }
 0x1d6   : > { %v816_v61 = vadd.f32 %v1364_v57, %v479_v53  ;;  %v824_v62 = vadd.f32 %v1388_v58, %v487_v55 }
 0x1d7   : > { %v1366_v0 = vpop.f32.mrf.mxu0  ;;  %v1390_v2 = vpop.f32.mrf.mxu1 }
 0x1d8   : > { %832 = vst [vmem:[#allocation2 + $0x68] sm:$0xff] %v816_v61  ;;  %840 = vst [vmem:[#allocation2 + $0x70] sm:$0xff] %v824_v62  ;;  %v1367_v3 = vadd.f32 %v1366_v0, %v1365_v59  ;;  %v1391_v4 = vadd.f32 %v1390_v2, %v1389_v60 }
 0x1d9   : > { %v1368_v5 = vpop.f32.mrf.mxu0  ;;  %v1392_v6 = vpop.f32.mrf.mxu1 }
 0x1da   : > { %v817_v7 = vadd.f32 %v1367_v3, %v480_v63  ;;  %v825_v8 = vadd.f32 %v1391_v4, %v488_v1 }
 0x1db   : > { %v1369_v10 = vpop.f32.mrf.mxu0  ;;  %v1393_v12 = vpop.f32.mrf.mxu1 }
 0x1dc   : > { %833 = vst [vmem:[#allocation2 + $0x8] sm:$0xff] %v817_v7  ;;  %841 = vst [vmem:[#allocation2 + $0x78] sm:$0xff] %v825_v8  ;;  %v1370_v13 = vadd.f32 %v1369_v10, %v1368_v5  ;;  %v1394_v14 = vadd.f32 %v1393_v12, %v1392_v6 }
 0x1de   : > { %v818_v15 = vadd.f32 %v1370_v13, %v481_v9  ;;  %v826_v16 = vadd.f32 %v1394_v14, %v489_v11 }
 0x1e0   : > { %834 = vst [vmem:[#allocation2 + $0x48] sm:$0xff] %v818_v15  ;;  %842 = vst [vmem:[#allocation2 + $0x28] sm:$0xff] %v826_v16 }
 0x1e1 PF: > { %v877_v17 = vld [vmem:[#allocation13 + $0x78] sm:$0xff]  ;;  %v876_v18 = vld [vmem:[#allocation13 + $0x70] sm:$0xff]  ;;  %v875_v19 = vld [vmem:[#allocation13 + $0x68] sm:$0xff]  ;;  %s2673_s9 = sld [smem:[#allocation28_spill]]  ;;  %v1031_v49 = vlaneseq  ;;  %s1127_s7 = sshll.u32 %s2416_s30, 4  ;;  %s2522_s7 = int_to_ptr.vmem [resolvable:$true] %s1127_s7 }
 0x1e2   : > { %1427 = vmatprep.subr.mxu0 %v877_v17  ;;  %1499 = vmatprep.subr.mxu1 %v877_v17  ;;  %v874_v20 = vld [vmem:[#allocation13 + $0x60] sm:$0xff]  ;;  %v873_v21 = vld [vmem:[#allocation13 + $0x58] sm:$0xff]  ;;  %v872_v22 = vld [vmem:[#allocation13 + $0x50] sm:$0xff]  ;;  %s2674_s2 = sld [smem:[#allocation36_spill]]  ;;  %s2530_s0 = scalar_lea.sflag [#allocation9], %s359_s26 }
 0x1e3   : > { %1428 = vmatpush3.msra.mxu0 %v877_v17  ;;  %1515 = vmatpush3.msra.mxu1 %v877_v17  ;;  %v871_v23 = vld [vmem:[#allocation13 + $0x48] sm:$0xff]  ;;  %v870_v24 = vld [vmem:[#allocation13 + $0x40] sm:$0xff]  ;;  %v869_v25 = vld [vmem:[#allocation13 + $0x38] sm:$0xff]  ;;  %v1032_v50 = vshrl.u32 %v1031_v49, 7  ;;  %s2675_s18 = sld [smem:[#allocation37_spill]]  ;;  %s1852_s8 = scalar_lea.vmem %s2522_s7, 2048 }
 0x1e4   : > { %1429 = vmatprep.subr.mxu0 %v876_v18  ;;  %1500 = vmatprep.subr.mxu1 %v876_v18  ;;  %v868_v26 = vld [vmem:[#allocation13 + $0x30] sm:$0xff]  ;;  %v867_v27 = vld [vmem:[#allocation13 + $0x28] sm:$0xff]  ;;  %v866_v28 = vld [vmem:[#allocation13 + $0x20] sm:$0xff]  ;;  %p1853_p13 = scmp.ne.s32.totalorder %s2522_s7, %s1852_s8  ;;  %p2677_p3 = scmp.ne.s32.totalorder %s2654_s3, 0 }
 0x1e5   : > { %1430 = vmatpush3.msra.mxu0 %v876_v18  ;;  %1516 = vmatpush3.msra.mxu1 %v876_v18  ;;  %v865_v29 = vld [vmem:[#allocation13 + $0x18] sm:$0xff]  ;;  %v864_v30 = vld [vmem:[#allocation13 + $0x10] sm:$0xff]  ;;  %v863_v31 = vld [vmem:[#allocation13 + $0x8] sm:$0xff]  ;;  %v1033_v51 = vadd.s32 8, %v1032_v50  ;;  %v1041_v52 = vadd.s32 72, %v1032_v50  ;;  %v1040_v54 = vadd.s32 64, %v1032_v50 }
 0x1e6   : > { %1431 = vmatprep.subr.mxu0 %v875_v19  ;;  %1501 = vmatprep.subr.mxu1 %v875_v19  ;;  %v862_v32 = vld [vmem:[#allocation13] sm:$0xff]  ;;  %v846_v33 = vld [vmem:[#allocation2 + $0x30] sm:$0xff]  ;;  %v848_v37 = vld [vmem:[#allocation2 + $0x58] sm:$0xff]  ;;  %v1035_v55 = vadd.s32 24, %v1032_v50  ;;  %v1043_v56 = vadd.s32 88, %v1032_v50  ;;  %v1034_v57 = vadd.s32 16, %v1032_v50  ;;  %p1854_p12 = pnand %p1853_p13, %p2677_p3 }
 0x1e7   : > { %1432 = vmatpush3.msra.mxu0 %v875_v19  ;;  %1517 = vmatpush3.msra.mxu1 %v875_v19  ;;  %v854_v34 = vld [vmem:[#allocation2 + $0x40] sm:$0xff]  ;;  %v856_v38 = vld [vmem:[#allocation2 + $0x10] sm:$0xff]  ;;  %v849_v39 = vld [vmem:[#allocation2 + $0x18] sm:$0xff]  ;;  %s1321_s10 = sshll.u32 %s2673_s9, 7  ;;  %v1042_v58 = vadd.s32 80, %v1032_v50  ;;  %v1037_v6 = vadd.s32 40, %v1032_v50 }
 0x1e8   : > { %1433 = vmatprep.subr.mxu0 %v874_v20  ;;  %1502 = vmatprep.subr.mxu1 %v874_v20  ;;  %v847_v35 = vld [vmem:[#allocation2] sm:$0xff]  ;;  %v857_v40 = vld [vmem:[#allocation2 + $0x38] sm:$0xff]  ;;  %v850_v41 = vld [vmem:[#allocation2 + $0x50] sm:$0xff]  ;;  %v2452_v53 = vstv %s1321_s10  ;;  %v1045_v7 = vadd.s32 104, %v1032_v50  ;;  %v1036_v12 = vadd.s32 32, %v1032_v50  ;;  %v1044_v13 = vadd.s32 96, %v1032_v50  ;;  %p1855_p10 = pneg %p1854_p12 }
 0x1e9   : > { %1434 = vmatpush3.msra.mxu0 %v874_v20  ;;  %1518 = vmatpush3.msra.mxu1 %v874_v20  ;;  %v855_v36 = vld [vmem:[#allocation2 + $0x20] sm:$0xff]  ;;  %v851_v43 = vld [vmem:[#allocation2 + $0x68] sm:$0xff]  ;;  %v859_v44 = vld [vmem:[#allocation2 + $0x70] sm:$0xff]  ;;  %v1050_v59 = vadd.s32 %v2452_v53, %v1033_v51  ;;  %v1058_v60 = vadd.s32 %v2452_v53, %v1041_v52  ;;  %v1049_v61 = vadd.s32 %v2452_v53, %v1032_v50  ;;  %s1330_s1 = sshll.u32 %s2673_s9, 11  ;;  %s2676_s28 = smov %s2675_s18 }
 0x1ea   : > { %1435 = vmatprep.subr.mxu0 %v873_v21  ;;  %1503 = vmatprep.subr.mxu1 %v873_v21  ;;  %v858_v42 = vld [vmem:[#allocation2 + $0x60] sm:$0xff]  ;;  %v852_v45 = vld [vmem:[#allocation2 + $0x8] sm:$0xff]  ;;  %v860_v46 = vld [vmem:[#allocation2 + $0x78] sm:$0xff]  ;;  %v1057_v62 = vadd.s32 %v2452_v53, %v1040_v54  ;;  %v1052_v63 = vadd.s32 %v2452_v53, %v1035_v55  ;;  %v1060_v0 = vadd.s32 %v2452_v53, %v1043_v56  ;;  %s2520_s5 = scalar_lea.hbm %s2675_s18, %s1330_s1  ;;  %s2006_s11 = smov [#allocation15]  }
 0x1eb   : > { %1436 = vmatpush3.msra.mxu0 %v873_v21  ;;  %1519 = vmatpush3.msra.mxu1 %v873_v21  ;;  %v853_v47 = vld [vmem:[#allocation2 + $0x48] sm:$0xff]  ;;  %v2463_v1 = vld [vmem:[%s2674_s2] ss:$0 sm:$0xff]  ;;  %v1051_v2 = vadd.s32 %v2452_v53, %v1034_v57  ;;  %v1059_v3 = vadd.s32 %v2452_v53, %v1042_v58  ;;  %vm1066_vm0 = vcmp.lt.s32.totalorder %v1050_v59, 160  ;;  %vm1074_vm1 = vcmp.lt.s32.totalorder %v1058_v60, 160  ;;  %s1856_s27 = sshll.u32 %s2006_s11, 4  ;;  %s1857_s27 = int_to_ptr.vmem [resolvable:$false] %s1856_s27 }
 0x1ec   : > { %1437 = vmatprep.subr.mxu0 %v872_v22  ;;  %1504 = vmatprep.subr.mxu1 %v872_v22  ;;  %v861_v48 = vld [vmem:[#allocation2 + $0x28] sm:$0xff]  ;;  %vm1065_vm2 = vcmp.lt.s32.totalorder %v1049_v61, 160  ;;  %vm1073_vm3 = vcmp.lt.s32.totalorder %v1057_v62, 160  ;;  %vm1068_vm4 = vcmp.lt.s32.totalorder %v1052_v63, 160  ;;  %vm1076_vm5 = vcmp.lt.s32.totalorder %v1060_v0, 160  ;;  %s1858_s29 = scalar_lea.vmem %s1857_s27, 4096  ;;  %p1859_p11 = scmp.lt.s32.totalorder %s2522_s7, %s1857_s27 }
 0x1ed   : > { %1438 = vmatpush3.msra.mxu0 %v872_v22  ;;  %1520 = vmatpush3.msra.mxu1 %v872_v22  ;;  %vm1067_vm6 = vcmp.lt.s32.totalorder %v1051_v2, 160  ;;  %vm1075_vm7 = vcmp.lt.s32.totalorder %v1059_v3, 160  ;;  %v1054_v20 = vadd.s32 %v2452_v53, %v1037_v6  ;;  %v1062_v21 = vadd.s32 %v2452_v53, %v1045_v7  ;;  %p1860_p7 = scmp.lt.s32.totalorder %s1858_s29, %s1852_s8 }
 0x1ee   : > { %1439 = vmatprep.subr.mxu0 %v871_v23  ;;  %1505 = vmatprep.subr.mxu1 %v871_v23  ;;  %v1039_v22 = vadd.s32 56, %v1032_v50 }
 0x1ef   : > { %1440 = vmatpush3.msra.mxu0 %v871_v23  ;;  %1521 = vmatpush3.msra.mxu1 %v871_v23  ;;  %v1047_v23 = vadd.s32 120, %v1032_v50  ;;  %vm1070_vm8 = vcmp.lt.s32.totalorder %v1054_v20, 160  ;;  %vm1078_vm9 = vcmp.lt.s32.totalorder %v1062_v21, 160  ;;  %p1861_p5 = por %p1860_p7, %p1859_p11 }
 0x1f0   : > { %1441 = vmatprep.subr.mxu0 %v870_v24  ;;  %1506 = vmatprep.subr.mxu1 %v870_v24 }
 0x1f1   : > { %1442 = vmatpush3.msra.mxu0 %v870_v24  ;;  %1522 = vmatpush3.msra.mxu1 %v870_v24  ;;  %p1862_p1 = pnand %p1861_p5, %p1855_p10 }
 0x1f2   : > { %1443 = vmatprep.subr.mxu0 %v869_v25  ;;  %1507 = vmatprep.subr.mxu1 %v869_v25 }
 0x1f3   : > { %1444 = vmatpush3.msra.mxu0 %v869_v25  ;;  %1523 = vmatpush3.msra.mxu1 %v869_v25 }
 0x1f4   : > { %1445 = vmatprep.subr.mxu0 %v868_v26  ;;  %1508 = vmatprep.subr.mxu1 %v868_v26 }
 0x1f5   : > { %1446 = vmatpush3.msra.mxu0 %v868_v26  ;;  %1524 = vmatpush3.msra.mxu1 %v868_v26 }
 0x1f6   : > { %1447 = vmatprep.subr.mxu0 %v867_v27  ;;  %1509 = vmatprep.subr.mxu1 %v867_v27 }
 0x1f7   : > { %1448 = vmatpush3.msra.mxu0 %v867_v27  ;;  %1525 = vmatpush3.msra.mxu1 %v867_v27 }
 0x1f8   : > { %1449 = vmatprep.subr.mxu0 %v866_v28  ;;  %1510 = vmatprep.subr.mxu1 %v866_v28 }
 0x1f9   : > { %1450 = vmatpush3.msra.mxu0 %v866_v28  ;;  %1526 = vmatpush3.msra.mxu1 %v866_v28 }
 0x1fa   : > { %1451 = vmatprep.subr.mxu0 %v865_v29  ;;  %1511 = vmatprep.subr.mxu1 %v865_v29 }
 0x1fb   : > { %1452 = vmatpush3.msra.mxu0 %v865_v29  ;;  %1527 = vmatpush3.msra.mxu1 %v865_v29 }
 0x1fc   : > { %1453 = vmatprep.subr.mxu0 %v864_v30  ;;  %1512 = vmatprep.subr.mxu1 %v864_v30 }
 0x1fd   : > { %1454 = vmatpush3.msra.mxu0 %v864_v30  ;;  %1528 = vmatpush3.msra.mxu1 %v864_v30  ;;  %v1053_v30 = vadd.s32 %v2452_v53, %v1036_v12 }
 0x1fe   : > { %1455 = vmatprep.subr.mxu0 %v863_v31  ;;  %1513 = vmatprep.subr.mxu1 %v863_v31 }
 0x1ff   : > { %1456 = vmatpush3.msra.mxu0 %v863_v31  ;;  %1529 = vmatpush3.msra.mxu1 %v863_v31  ;;  %v1061_v31 = vadd.s32 %v2452_v53, %v1044_v13  ;;  %vm1069_vm10 = vcmp.lt.s32.totalorder %v1053_v30, 160 }
 0x200   : > { %1457 = vmatprep.subr.mxu0 %v862_v32  ;;  %1514 = vmatprep.subr.mxu1 %v862_v32 }
 0x201   : > { %1458 = vmatpush3.msra.mxu0 %v862_v32  ;;  %1530 = vmatpush3.msra.mxu1 %v862_v32  ;;  %v1038_v32 = vadd.s32 48, %v1032_v50  ;;  %vm1077_vm11 = vcmp.lt.s32.totalorder %v1061_v31, 160 }
 0x202   : > { %1459 = vmatprep.mubr.f32.mxu0 %v846_v33  ;;  %1471 = vmatprep.mubr.f32.mxu1 %v854_v34  ;;  %v1046_v33 = vadd.s32 112, %v1032_v50 }
 0x203   : > { %1460 = vmatmul.mubr.f32.vlgmr.msra.gmra.mxu0 %v847_v35  ;;  %1472 = vmatmul.mubr.f32.vlgmr.msra.gmra.mxu1 %v855_v36 }
 0x204   : > { %1462 = vmatprep.mubr.f32.mxu0 %v848_v37  ;;  %1474 = vmatprep.mubr.f32.mxu1 %v856_v38  ;;  %v1063_v49 = vadd.s32 %v2452_v53, %v1046_v33 }
 0x206   : > { %vm1079_vm15 = vcmp.lt.s32.totalorder %v1063_v49, 160 }
 0x207   : > { %1463 = vmatmul.mubr.f32.gmra.mxu0 %v849_v39  ;;  %1475 = vmatmul.mubr.f32.gmra.mxu1 %v857_v40  ;;  %v1056_v40 = vadd.s32 %v2452_v53, %v1039_v22 }
 0x208   : > { %1465 = vmatprep.mubr.f32.mxu0 %v850_v41  ;;  %1477 = vmatprep.mubr.f32.mxu1 %v858_v42  ;;  %v1064_v41 = vadd.s32 %v2452_v53, %v1047_v23 }
 0x209   : > { %vm1072_vm12 = vcmp.lt.s32.totalorder %v1056_v40, 160 }
 0x20a   : > { %vm1080_vm13 = vcmp.lt.s32.totalorder %v1064_v41, 160 }
 0x20b   : > { %1466 = vmatmul.mubr.f32.gmra.mxu0 %v851_v43  ;;  %1478 = vmatmul.mubr.f32.gmra.mxu1 %v859_v44 }
 0x20c   : > { %1468 = vmatprep.mubr.f32.mxu0 %v852_v45  ;;  %1480 = vmatprep.mubr.f32.mxu1 %v860_v46 }
 0x20f   : > { %1469 = vmatmul.mubr.f32.gmra.mxu0 %v853_v47  ;;  %1481 = vmatmul.mubr.f32.gmra.mxu1 %v861_v48  ;;  %v1055_v48 = vadd.s32 %v2452_v53, %v1038_v32 }
 0x211   : > { %vm1071_vm14 = vcmp.lt.s32.totalorder %v1055_v48, 160 }
 0x2c3   : > { %v1461_v4 = vpop.f32.mrf.mxu0  ;;  %v1473_v5 = vpop.f32.mrf.mxu1 }
 0x2c4   : > { %v957_v8 = vadd.f32 %v1461_v4, %v2463_v1  ;;  %v997_v9 = vadd.f32 %v1473_v5, %v2463_v1 }
 0x2c5   : > { %v951_v10 = vpop.f32.mrf.mxu0  ;;  %v991_v11 = vpop.f32.mrf.mxu1 }
 0x2c6   : > { %v1082_v14 = vsel %vm1066_vm0, %v957_v8, 0.0  ;;  %v1090_v15 = vsel %vm1074_vm1, %v997_v9, 0.0  ;;  %v952_v16 = vadd.f32 %v2463_v1, %v951_v10  ;;  %v992_v17 = vadd.f32 %v2463_v1, %v991_v11 }
 0x2c7   : > { %1098 = vst [vmem:[%s2416_s30 + $0x8] sm:$0xff] %v1082_v14  ;;  %1106 = vst [vmem:[%s2416_s30 + $0x48] sm:$0xff] %v1090_v15  ;;  %v1464_v18 = vpop.f32.mrf.mxu0  ;;  %v1476_v19 = vpop.f32.mrf.mxu1 }
 0x2c8   : > { %v1081_v24 = vsel %vm1065_vm2, %v952_v16, 0.0  ;;  %v1089_v25 = vsel %vm1073_vm3, %v992_v17, 0.0  ;;  %v967_v26 = vadd.f32 %v1464_v18, %v2463_v1  ;;  %v1007_v27 = vadd.f32 %v1476_v19, %v2463_v1 }
 0x2c9   : > { %1097 = vst [vmem:[%s2416_s30] sm:$0xff] %v1081_v24  ;;  %1105 = vst [vmem:[%s2416_s30 + $0x40] sm:$0xff] %v1089_v25  ;;  %v961_v28 = vpop.f32.mrf.mxu0  ;;  %v1001_v29 = vpop.f32.mrf.mxu1 }
 0x2ca   : > { %v1084_v34 = vsel %vm1068_vm4, %v967_v26, 0.0  ;;  %v1092_v35 = vsel %vm1076_vm5, %v1007_v27, 0.0  ;;  %v962_v36 = vadd.f32 %v2463_v1, %v961_v28  ;;  %v1002_v37 = vadd.f32 %v2463_v1, %v1001_v29 }
 0x2cb   : > { %1100 = vst [vmem:[%s2416_s30 + $0x18] sm:$0xff] %v1084_v34  ;;  %1108 = vst [vmem:[%s2416_s30 + $0x58] sm:$0xff] %v1092_v35  ;;  %v1467_v38 = vpop.f32.mrf.mxu0  ;;  %v1479_v39 = vpop.f32.mrf.mxu1 }
 0x2cc   : > { %v1083_v42 = vsel %vm1067_vm6, %v962_v36, 0.0  ;;  %v1091_v43 = vsel %vm1075_vm7, %v1002_v37, 0.0  ;;  %v977_v44 = vadd.f32 %v1467_v38, %v2463_v1  ;;  %v1017_v45 = vadd.f32 %v1479_v39, %v2463_v1 }
 0x2cd   : > { %1099 = vst [vmem:[%s2416_s30 + $0x10] sm:$0xff] %v1083_v42  ;;  %1107 = vst [vmem:[%s2416_s30 + $0x50] sm:$0xff] %v1091_v43  ;;  %v971_v46 = vpop.f32.mrf.mxu0  ;;  %v1011_v47 = vpop.f32.mrf.mxu1 }
 0x2ce   : > { %v1086_v50 = vsel %vm1070_vm8, %v977_v44, 0.0  ;;  %v1094_v51 = vsel %vm1078_vm9, %v1017_v45, 0.0  ;;  %v972_v52 = vadd.f32 %v2463_v1, %v971_v46  ;;  %v1012_v54 = vadd.f32 %v2463_v1, %v1011_v47 }
 0x2cf   : > { %1102 = vst [vmem:[%s2416_s30 + $0x28] sm:$0xff] %v1086_v50  ;;  %1110 = vst [vmem:[%s2416_s30 + $0x68] sm:$0xff] %v1094_v51  ;;  %v1470_v55 = vpop.f32.mrf.mxu0  ;;  %v1482_v56 = vpop.f32.mrf.mxu1 }
 0x2d0   : > { %v1085_v53 = vsel %vm1069_vm10, %v972_v52, 0.0  ;;  %v1093_v57 = vsel %vm1077_vm11, %v1012_v54, 0.0  ;;  %v987_v58 = vadd.f32 %v1470_v55, %v2463_v1  ;;  %v1027_v59 = vadd.f32 %v1482_v56, %v2463_v1 }
 0x2d1   : > { %1101 = vst [vmem:[%s2416_s30 + $0x20] sm:$0xff] %v1085_v53  ;;  %1109 = vst [vmem:[%s2416_s30 + $0x60] sm:$0xff] %v1093_v57  ;;  %v981_v60 = vpop.f32.mrf.mxu0  ;;  %v1021_v61 = vpop.f32.mrf.mxu1 }
 0x2d2   : > { %v1088_v62 = vsel %vm1072_vm12, %v987_v58, 0.0  ;;  %v1096_v63 = vsel %vm1080_vm13, %v1027_v59, 0.0  ;;  %v982_v0 = vadd.f32 %v2463_v1, %v981_v60  ;;  %v1022_v2 = vadd.f32 %v2463_v1, %v1021_v61 }
 0x2d3   : > { %1104 = vst [vmem:[%s2416_s30 + $0x38] sm:$0xff] %v1088_v62  ;;  %1112 = vst [vmem:[%s2416_s30 + $0x78] sm:$0xff] %v1096_v63 }
 0x2d4   : > { %v1087_v3 = vsel %vm1071_vm14, %v982_v0, 0.0  ;;  %v1095_v4 = vsel %vm1079_vm15, %v1022_v2, 0.0 }
 0x2d5   : > { %1103 = vst [vmem:[%s2416_s30 + $0x30] sm:$0xff] %v1087_v3  ;;  %1111 = vst [vmem:[%s2416_s30 + $0x70] sm:$0xff] %v1095_v4 }
 0x2d6   : > { %1865 = shalt.err (!%p1862_p1)
}
 0x2d7   : > { %s1866_s26 = scalar_lea.hbm %s2520_s5, 2048  ;;  %s1870_s30 = scalar_lea.hbm %s2676_s28, 4096 }
 0x2d8   : > { %p1867_p2 = scmp.ne.s32.totalorder %s2520_s5, %s1866_s26  ;;  %p1871_p9 = scmp.lt.s32.totalorder %s2520_s5, %s2676_s28 }
 0x2d9   : > { %p1872_p0 = scmp.lt.s32.totalorder %s1870_s30, %s1866_s26 }
 0x2da   : > { %p1868_p6 = pnand %p1867_p2, %p2677_p3 }
 0x2db   : > { %p1873_p13 = por %p1872_p0, %p1871_p9 }
 0x2dc   : > { %p1869_p8 = pneg %p1868_p6 }
 0x2de   : > { %p1874_p12 = pnand %p1873_p13, %p1869_p8 }
 0x2e0   : > { %1877 = shalt.err (!%p1874_p12)
}
 0x2e1   : > { %s2007_s22 = smov 128   ;;  %s2008_s20 = smov 8  }
 0x2e2   : > { %1545 = dma.vmem_to_hbm [thread:$0]  (%p2677_p3), %s2522_s7, 2048, %s2520_s5, %s2530_s0, %s2007_s22, %s2007_s22, %s2008_s20  }
 0x2e3 PF: > { %s1142_s2 = sand.u32 1, %s1950_s15   ;;  %p2678_p10 = scmp.ge.s32.totalorder %s1994_s25, 2 }
 0x2e4   : > { %s1143_s1 = scalar_lea.sflag [#allocation9], %s1142_s2 }
 0x2e5   : > { %p1566_p11 = pnand %p2678_p10, %p2340_p4 }
 0x2e7   : > { %p1567_p7 = pneg %p1566_p11 }
 0x2e9   : > { %1945 = dma.done.wait (%p1567_p7), %s1143_s1, 2048  }
 0x2ea   : > { %1947 = vsyncadd (%p1567_p7), %s1143_s1, 4294965248  ;;  %s39_s25 = sadd.s32 1, %s1994_s25   ;;  %s2679_s6 = sld [smem:[#allocation32_spill]] }
 0x2eb   : > { %p36_p5 = scmp.ge.s32.totalorder %s39_s25, 4   ;;  %s2680_s3 = sld [smem:[#allocation26_spill]] }
 0x2ec   : > { %s2681_s5 = sld [smem:[#allocation30_spill]]  ;;  %s2685_s15 = smov %s1954_s16 }
 0x2ed   : > { %s2682_s7 = sld [smem:[#allocation27_spill]]  ;;  %s2686_s16 = smov %s1958_s17 }
 0x2ee   : > { %s2683_s22 = sld [smem:[#allocation31_spill]]  ;;  %s2688_s18 = smov %s1966_s19 }
 0x2ef   : > { %s2684_s13 = sld [smem:[#allocation29_spill]]  ;;  %s2690_s20 = smov %s1978_s21 }
 0x2f0   : > { %s2687_s17 = smov %s2679_s6  ;;  %s2692_s23 = smov %s1990_s24 }
 0x2f1   : > { %s2689_s19 = smov %s2680_s3  ;;  %38 = sbr.rel (!%p36_p5) target bundleno = 40 (0x28), region = 129 }
 0x2f3   : > { %s2691_s21 = smov %s2682_s7 }
 0x2f5   : > { %s2693_s24 = smov %s2684_s13 }
 0x2f6   :  { %1148 = vsyncpa [#allocation8], 1 }
 0x2f7   :  { %1150 = vsyncpa [#allocation8 + $0x1], 1 }
 0x2f8   :  { %1151 = vsyncpa [#allocation11], 1 }
 0x2f9   :  { %1153 = vsyncpa [#allocation11 + $0x1], 1 }
 0x2fa   :  { %1154 = vsyncpa [#allocation14], 1 }
 0x2fb   :  { %1155 = vsyncpa [#allocation9], 1 }
 0x2fc   :  { %1157 = vsyncpa [#allocation9 + $0x1], 1 }

</bundles_post_ra>
